<compile_context>
chip_gen: v7x
topology: tpu7x:2x2x1
jax: 0.10.0
libtpu: 0.0.40
codegen_flags: <defaults>
</compile_context>

<pallas_src>
import functools

import jax
import jax.numpy as jnp
from jax import lax
from jax.experimental import pallas as pl
from jax.experimental.pallas import tpu as pltpu

EPS = 1e-5
LANE = 128            # channel padding target (lane width)
TILE_M = 1024         # upper bound on rows per block for M-tiled kernels
_VMEM_LIMIT = None


# ------------------------------ small helpers --------------------------------

def _round_up(x, m):
    return (x + m - 1) // m * m


def _cdiv(a, b):
    return (a + b - 1) // b


def _vmem_limit_bytes():
    """~3/4 of physical VMEM (96 MiB on v5e/v6e, 48 MiB on v7x); 32 MiB fallback."""
    global _VMEM_LIMIT
    if _VMEM_LIMIT is None:
        try:
            cap = int(pltpu.get_tpu_info().vmem_capacity_bytes)
            if cap < (32 << 20):
                raise ValueError(cap)
            _VMEM_LIMIT = min(96 << 20, (cap * 3) // 4)
        except Exception:
            _VMEM_LIMIT = 32 << 20
    return _VMEM_LIMIT


def _mosaic(sem):
    return pltpu.CompilerParams(dimension_semantics=sem,
                                vmem_limit_bytes=_vmem_limit_bytes())


def _tile_m(m, bytes_per_row=None):
    """Row tiling that (a) minimises row padding, (b) keeps an even number (>=2)
    of tiles so both v7x TensorCores get work, (c) caps per-buffer VMEM."""
    tile_m = TILE_M
    if bytes_per_row:
        cap = max(8, ((4 << 20) // bytes_per_row) // 8 * 8)
        tile_m = min(tile_m, cap)
    n_tiles = _cdiv(m, tile_m)
    if m >= 16:
        n_tiles = max(n_tiles, 2)
        n_tiles += n_tiles % 2
    tm = _round_up(_cdiv(m, n_tiles), 8)
    return n_tiles, tm, n_tiles * tm


# ------------------------------ Pallas kernels -------------------------------

def bn_stats_kernel(x_ref, st_ref):
    """Per-tile partial sum / sum-of-squares -> rows 0/1 of an (8, C) block."""
    x = x_ref[...].astype(jnp.float32)
    s = jnp.sum(x, axis=0, keepdims=True)
    q = jnp.sum(x * x, axis=0, keepdims=True)
    st_ref[0] = jnp.concatenate(
        [s, q, jnp.zeros((6, x.shape[-1]), jnp.float32)], axis=0)


def _im2col_dot(x_ref, w_ref, b_ref, ho, wo):
    """In-VMEM im2col of a zero-padded (1, ho+2, wo+2, C) pre-activated tile,
    then a single MXU matmul with the (9*C, Cout_tot) BN-folded weights."""
    c = x_ref.shape[-1]
    taps = []
    for kh in range(3):
        for kw in range(3):
            t = x_ref[0, kh:kh + ho, kw:kw + wo, :]
            taps.append(t.reshape(ho * wo, c))
    p = jnp.concatenate(taps, axis=-1)                        # (ho*wo, 9*C) bf16
    return jnp.dot(p, w_ref[...], preferred_element_type=jnp.float32) + b_ref[...]


def conv1_s1_kernel(o1_ref, w_ref, b_ref, y_ref, st_ref, *, ho, wo, cout_p):
    """conv1 (3x3, stride 1) on pre-activated input.  BN2 partial stats fused
    into the epilogue; an optional fused 1x1 projection skip rides along as the
    extra output columns of w_ref."""
    acc = _im2col_dot(o1_ref, w_ref, b_ref, ho, wo)           # (ho*wo, cout_tot) f32
    y_ref[0] = acc.reshape(ho, wo, acc.shape[-1]).astype(y_ref.dtype)
    y1 = acc[:, :cout_p]
    s = jnp.sum(y1, axis=0, keepdims=True)
    q = jnp.sum(y1 * y1, axis=0, keepdims=True)
    st_ref[0] = jnp.concatenate(
        [s, q, jnp.zeros((6, cout_p), jnp.float32)], axis=0)


def conv1_patches_kernel(p_ref, w_ref, b_ref, y_ref, st_ref, *, cout_p):
    """conv1 via pre-built im2col patches (stride-2 fallback); BN2 partial stats
    fused into the epilogue."""
    acc = jnp.dot(p_ref[...], w_ref[...],
                  preferred_element_type=jnp.float32) + b_ref[...]
    y_ref[...] = acc.astype(y_ref.dtype)
    y1 = acc[:, :cout_p]
    s = jnp.sum(y1, axis=0, keepdims=True)
    q = jnp.sum(y1 * y1, axis=0, keepdims=True)
    st_ref[0] = jnp.concatenate(
        [s, q, jnp.zeros((6, cout_p), jnp.float32)], axis=0)


def conv2_kernel(o2_ref, w_ref, b_ref, skip_ref, out_ref, *, ho, wo):
    """conv2 (3x3, stride 1) with bias + residual add fused into the epilogue."""
    acc = _im2col_dot(o2_ref, w_ref, b_ref, ho, wo)
    acc = acc + skip_ref[0].astype(jnp.float32).reshape(ho * wo, acc.shape[-1])
    out_ref[0] = acc.reshape(ho, wo, acc.shape[-1])


# ----------------------------- pallas_call wrappers --------------------------

def bn_stats(x2d):
    """Per-channel batch mean / inv-std via parallel per-tile partial sums."""
    m, c = x2d.shape
    n_tiles, tm, mp = _tile_m(m, bytes_per_row=c * x2d.dtype.itemsize)
    if mp != m:
        x2d = jnp.pad(x2d, ((0, mp - m), (0, 0)))   # zero rows don't change sums
    st = pl.pallas_call(
        bn_stats_kernel,
        out_shape=jax.ShapeDtypeStruct((n_tiles, 8, c), jnp.float32),
        grid_spec=pltpu.PrefetchScalarGridSpec(
            num_scalar_prefetch=0, grid=(n_tiles,),
            in_specs=[pl.BlockSpec((tm, c), lambda i: (i, 0))],
            out_specs=pl.BlockSpec((1, 8, c), lambda i: (i, 0, 0))),
        compiler_params=_mosaic(("parallel",)),
    )(x2d)
    sums = jnp.sum(st[:, 0, :], axis=0)
    sqs = jnp.sum(st[:, 1, :], axis=0)
    mean = sums / m
    # Single-pass E[x^2]-E[x]^2 (clamped >=0).  Fine for standardised activations.
    # TODO(synk): switch to a two-pass / shifted accumulation for large means.
    var = jnp.maximum(sqs / m - mean * mean, 0.0)
    return mean, lax.rsqrt(var + EPS)


def conv1_s1(o1, w, b, cout_p):
    n, hp, wp, cin_p = o1.shape
    ho, wo = hp - 2, wp - 2
    cout_tot = w.shape[1]
    kern = functools.partial(conv1_s1_kernel, ho=ho, wo=wo, cout_p=cout_p)
    return pl.pallas_call(
        kern,
        out_shape=(jax.ShapeDtypeStruct((n, ho, wo, cout_tot), jnp.bfloat16),
                   jax.ShapeDtypeStruct((n, 8, cout_p), jnp.float32)),
        grid_spec=pltpu.PrefetchScalarGridSpec(
            num_scalar_prefetch=0, grid=(n,),
            in_specs=[pl.BlockSpec((1, hp, wp, cin_p), lambda i: (i, 0, 0, 0)),
                      pl.BlockSpec((9 * cin_p, cout_tot), lambda i: (0, 0)),
                      pl.BlockSpec((1, cout_tot), lambda i: (0, 0))],
            out_specs=(pl.BlockSpec((1, ho, wo, cout_tot), lambda i: (i, 0, 0, 0)),
                       pl.BlockSpec((1, 8, cout_p), lambda i: (i, 0, 0)))),
        compiler_params=_mosaic(("parallel",)),
    )(o1, w, b)


def conv1_patches(p, w, b, cout_p, n_tiles, tm):
    mp, kc = p.shape
    cout_tot = w.shape[1]
    kern = functools.partial(conv1_patches_kernel, cout_p=cout_p)
    return pl.pallas_call(
        kern,
        out_shape=(jax.ShapeDtypeStruct((mp, cout_tot), jnp.bfloat16),
                   jax.ShapeDtypeStruct((n_tiles, 8, cout_p), jnp.float32)),
        grid_spec=pltpu.PrefetchScalarGridSpec(
            num_scalar_prefetch=0, grid=(n_tiles,),
            in_specs=[pl.BlockSpec((tm, kc), lambda i: (i, 0)),
                      pl.BlockSpec((kc, cout_tot), lambda i: (0, 0)),
                      pl.BlockSpec((1, cout_tot), lambda i: (0, 0))],
            out_specs=(pl.BlockSpec((tm, cout_tot), lambda i: (i, 0)),
                       pl.BlockSpec((1, 8, cout_p), lambda i: (i, 0, 0)))),
        compiler_params=_mosaic(("parallel",)),
    )(p, w, b)


def conv2_residual(o2, w, b, skip):
    n, hp, wp, c_p = o2.shape
    ho, wo = hp - 2, wp - 2
    cout_p = w.shape[1]
    kern = functools.partial(conv2_kernel, ho=ho, wo=wo)
    return pl.pallas_call(
        kern,
        out_shape=jax.ShapeDtypeStruct((n, ho, wo, cout_p), jnp.float32),
        grid_spec=pltpu.PrefetchScalarGridSpec(
            num_scalar_prefetch=0, grid=(n,),
            in_specs=[pl.BlockSpec((1, hp, wp, c_p), lambda i: (i, 0, 0, 0)),
                      pl.BlockSpec((9 * c_p, cout_p), lambda i: (0, 0)),
                      pl.BlockSpec((1, cout_p), lambda i: (0, 0)),
                      pl.BlockSpec((1, ho, wo, cout_p), lambda i: (i, 0, 0, 0))],
            out_specs=pl.BlockSpec((1, ho, wo, cout_p), lambda i: (i, 0, 0, 0))),
        compiler_params=_mosaic(("parallel",)),
    )(o2, w, b, skip)


# --------------------------------- glue ---------------------------------------

def extract_patches_3x3(o_pad, stride, ho, wo):
    """Wrapper-side im2col (stride-2 fallback only).  o_pad: [N, H+2, W+2, C]
    (already pre-activated + zero padded) -> [N*ho*wo, 9*C] tap-major columns."""
    n, _, _, c = o_pad.shape
    taps = []
    for kh in range(3):
        for kw in range(3):
            taps.append(o_pad[:, kh:kh + stride * (ho - 1) + 1:stride,
                                 kw:kw + stride * (wo - 1) + 1:stride, :])
    p = jnp.stack(taps, axis=3)                           # [N, ho, wo, 9, C]
    return p.reshape(n * ho * wo, 9 * c)


def _fold_conv_weight(w_hwio, inv_in, cin_p, cout_p):
    """Scale input channels by BN inv_std (folded BN), pad and flatten to
    (kh*kw*cin_p, cout_p) bf16."""
    kh, kw, cin, cout = w_hwio.shape
    w = w_hwio * inv_in[:cin].reshape(1, 1, cin, 1)
    w = jnp.pad(w, ((0, 0), (0, 0), (0, cin_p - cin), (0, cout_p - cout)))
    return w.reshape(kh * kw * cin_p, cout_p).astype(jnp.bfloat16)


def _pad_bias(b, cout_p):
    return jnp.pad(b, (0, cout_p - b.shape[0])).reshape(1, cout_p).astype(jnp.float32)


def basic_block_forward(x_nchw, params, stride):
    x = jnp.transpose(x_nchw, (0, 2, 3, 1)).astype(jnp.float32)     # NCHW -> NHWC
    n, h, w, cin = x.shape
    cout = params["w1"].shape[-1]
    cin_p = _round_up(cin, LANE)
    cout_p = _round_up(cout, LANE)
    has_proj = "ws" in params

    x_p = jnp.pad(x, ((0, 0), (0, 0), (0, 0), (0, cin_p - cin)))    # lane-dense

    # ---- BN1 batch statistics ----
    mean1, inv1 = bn_stats(x_p.reshape(n * h * w, cin_p))

    # o1 = relu(bn1(x)) with inv_std folded into the conv weights: only
    # mean-centering + relu + bf16 cast here (one fused XLA pass); the spatial
    # zero padding stays exactly zero after relu.
    o1 = jnp.pad(jnp.maximum(x_p - mean1, 0.0).astype(jnp.bfloat16),
                 ((0, 0), (1, 1), (1, 1), (0, 0)))

    # conv1 weights (BN1 folded).  The 1x1 projection skip (if any) rides along
    # as extra output columns; its only nonzero rows are the centre-tap block.
    w1 = _fold_conv_weight(params["w1"], inv1, cin_p, cout_p)
    b1 = _pad_bias(params["b1"], cout_p)
    if has_proj:
        wsk = _fold_conv_weight(params["ws"], inv1, cin_p, cout_p)  # (cin_p, cout_p)
        ws_full = jnp.zeros((9 * cin_p, cout_p), jnp.bfloat16)
        ws_full = ws_full.at[4 * cin_p:5 * cin_p, :].set(wsk)
        w1 = jnp.concatenate([w1, ws_full], axis=1)                 # (9cin_p, 2cout_p)
        b1 = jnp.concatenate([b1, _pad_bias(params["bs"], cout_p)], axis=1)

    ho = (h - 1) // stride + 1
    wo = (w - 1) // stride + 1
    m = n * ho * wo

    # ---- conv1 (+ fused skip) with BN2 partial stats in the epilogue ----
    if stride == 1:
        y1, st = conv1_s1(o1, w1, b1, cout_p)          # (n, ho, wo, cout_tot) bf16
        sum2 = jnp.sum(st[:, 0, :], axis=0)
        sq2 = jnp.sum(st[:, 1, :], axis=0)
    else:
        p1 = extract_patches_3x3(o1, stride, ho, wo)                # (m, 9cin_p) bf16
        n_tiles, tm, mp = _tile_m(m, bytes_per_row=2 * 9 * cin_p)
        if mp != m:
            p1 = jnp.pad(p1, ((0, mp - m), (0, 0)))
        y1_2d, st = conv1_patches(p1, w1, b1, cout_p, n_tiles, tm)
        # Padded (all-zero) patch rows contribute exactly b1 to y; correct the
        # partial sums analytically instead of masking in-kernel.
        n_pad = mp - m
        b1v = b1[0, :cout_p]
        sum2 = jnp.sum(st[:, 0, :], axis=0) - n_pad * b1v
        sq2 = jnp.sum(st[:, 1, :], axis=0) - n_pad * b1v * b1v
        y1 = y1_2d[:m].reshape(n, ho, wo, -1)

    mean2 = sum2 / m
    var2 = jnp.maximum(sq2 / m - mean2 * mean2, 0.0)
    inv2 = lax.rsqrt(var2 + EPS)

    # o2 = relu(bn2(y1)) with inv2 folded into conv2's weights (one fused pass).
    o2 = jnp.pad(
        jnp.maximum(y1[..., :cout_p].astype(jnp.float32) - mean2,
                    0.0).astype(jnp.bfloat16),
        ((0, 0), (1, 1), (1, 1), (0, 0)))

    # Residual: projection skip = extra output columns of conv1 (bf16); identity
    # skip = original x, kept f32 (read exactly once, so a bf16 copy would cost
    # more HBM traffic than it saves).
    skip = y1[..., cout_p:] if has_proj else x_p

    w2 = _fold_conv_weight(params["w2"], inv2, cout_p, cout_p)
    b2 = _pad_bias(params["b2"], cout_p)

    out = conv2_residual(o2, w2, b2, skip)             # (n, ho, wo, cout_p) f32
    return jnp.transpose(out[..., :cout], (0, 3, 1, 2))   # NHWC -> NCHW


# --------------------------- params / reference -------------------------------

def init_params(key, cin, cout, stride):
    """Kaiming-normal conv weights (HWIO), zero biases (matches the module init)."""
    k1, k2, k3 = jax.random.split(key, 3)
    params = {
        "w1": jax.random.normal(k1, (3, 3, cin, cout), jnp.float32)
              * (2.0 / (cin * 9)) ** 0.5,
        "b1": jnp.zeros((cout,), jnp.float32),
        "w2": jax.random.normal(k2, (3, 3, cout, cout), jnp.float32)
              * (2.0 / (cout * 9)) ** 0.5,
        "b2": jnp.zeros((cout,), jnp.float32),
    }
    if cin != cout or stride != 1:
        params["ws"] = jax.random.normal(k3, (1, 1, cin, cout), jnp.float32) \
                       * (2.0 / cin) ** 0.5
        params["bs"] = jnp.zeros((cout,), jnp.float32)
    return params


def ref_forward(x_nchw, params, stride):
    dn = ('NHWC', 'HWIO', 'NHWC')
    x = jnp.transpose(x_nchw, (0, 2, 3, 1))

    def bn_relu_ref(t):
        mu = t.mean(axis=(0, 1, 2), keepdims=True)
        var = ((t - mu) ** 2).mean(axis=(0, 1, 2), keepdims=True)
        return jnp.maximum((t - mu) * lax.rsqrt(var + EPS), 0.0)

    o1 = bn_relu_ref(x)
    y1 = lax.conv_general_dilated(o1, params["w1"], (stride, stride),
                                  ((1, 1), (1, 1)), dimension_numbers=dn) + params["b1"]
    o2 = bn_relu_ref(y1)
    z = lax.conv_general_dilated(o2, params["w2"], (1, 1),
                                 ((1, 1), (1, 1)), dimension_numbers=dn) + params["b2"]
    if "ws" in params:
        sk = lax.conv_general_dilated(o1, params["ws"], (stride, stride),
                                      ((0, 0), (0, 0)), dimension_numbers=dn) + params["bs"]
        out = z + sk
    else:
        out = z + x
    return jnp.transpose(out, (0, 3, 1, 2))


# ---------------------------------- main --------------------------------------

def _run_case(name, key, N, Cin, H, W, Cout, stride):
    kx, kp = jax.random.split(key)
    x = jax.random.normal(kx, (N, Cin, H, W), jnp.float32)
    params = init_params(kp, Cin, Cout, stride)

    fwd = jax.jit(basic_block_forward, static_argnums=(2,))
    out = jax.block_until_ready(fwd(x, params, stride))
    ref = ref_forward(x, params, stride)
    assert out.shape == ref.shape, (name, out.shape, ref.shape)
    # bf16 MXU operands + bf16 intermediates (f32 accumulation) -> loose tolerance
    # vs the all-f32 reference.
    if not jnp.allclose(out, ref, atol=4e-2, rtol=4e-2):
        raise AssertionError(
            f"{name}: mismatch, max abs diff "
            f"{float(jnp.max(jnp.abs(out - ref)))}")


if __name__ == "__main__":
    key = jax.random.PRNGKey(0)
    k1, k2 = jax.random.split(key)
    # projection-skip branch (skip_conv): Cin != Cout, stride 2
    _run_case("proj_skip", k1, N=2, Cin=4, H=16, W=16, Cout=8, stride=2)
    # identity-skip branch: Cin == Cout, stride 1
    _run_case("identity_skip", k2, N=2, Cin=8, H=8, W=8, Cout=8, stride=1)
    print("KERNEL_OK")
</pallas_src>

<mosaic_0001>
module attributes {stable_mosaic.version = 11 : i64} {
  func.func @bn_stats_kernel(%arg0: i32, %arg1: memref<256x128xf32, #tpu.memory_space<vmem>>, %arg2: memref<1x8x128xf32, #tpu.memory_space<vmem>>) attributes {dimension_semantics = [#tpu.dimension_semantics<parallel>], iteration_bounds = array<i64: 2>, scalar_prefetch = 0 : i64, scratch_operands = 0 : i64, tpu.core_type = #tpu.core_type<tc>, window_params = [{transform_indices = @transform_0, window_bounds = array<i64: 256, 128>}, {transform_indices = @transform_1, window_bounds = array<i64: 1, 8, 128>}]} {
    %c0 = arith.constant 0 : index
    %c0_0 = arith.constant 0 : index
    %0 = vector.load %arg1[%c0, %c0_0] : memref<256x128xf32, #tpu.memory_space<vmem>>, vector<256x128xf32>
    %cst = arith.constant dense<0.000000e+00> : vector<128xf32>
    %1 = vector.multi_reduction <add>, %0, %cst [0] : vector<256x128xf32> to vector<128xf32>
    %2 = vector.shape_cast %1 : vector<128xf32> to vector<1x128xf32>
    %3 = arith.mulf %0, %0 : vector<256x128xf32>
    %cst_1 = arith.constant dense<0.000000e+00> : vector<128xf32>
    %4 = vector.multi_reduction <add>, %3, %cst_1 [0] : vector<256x128xf32> to vector<128xf32>
    %5 = vector.shape_cast %4 : vector<128xf32> to vector<1x128xf32>
    %cst_2 = arith.constant 0.000000e+00 : f32
    %6 = vector.broadcast %cst_2 : f32 to vector<6x128xf32>
    %7 = tpu.concatenate %2, %5, %6 in 0 : vector<1x128xf32>, vector<1x128xf32>, vector<6x128xf32> -> vector<8x128xf32>
    %c0_3 = arith.constant 0 : index
    %c0_4 = arith.constant 0 : index
    %c0_5 = arith.constant 0 : index
    %8 = vector.load %arg2[%c0_3, %c0_4, %c0_5] : memref<1x8x128xf32, #tpu.memory_space<vmem>>, vector<1x8x128xf32>
    %9 = vector.shape_cast %8 : vector<1x8x128xf32> to vector<8x128xf32>
    %10 = vector.shape_cast %7 : vector<8x128xf32> to vector<1x8x128xf32>
    tpu.vector_store %arg2[%c0_3, %c0_4, %c0_5], %10 {strides = array<i32>} : memref<1x8x128xf32, #tpu.memory_space<vmem>>, vector<1x8x128xf32>,
    return
  }
  func.func @transform_0(%arg0: i32) -> (i32, i32) {
    %c0_i32 = arith.constant 0 : i32
    %c0_i32_0 = arith.constant 0 : i32
    return %arg0, %c0_i32 : i32, i32
  }
  func.func @transform_1(%arg0: i32) -> (i32, i32, i32) {
    %c0_i32 = arith.constant 0 : i32
    %c0_i32_0 = arith.constant 0 : i32
    %c0_i32_1 = arith.constant 0 : i32
    return %arg0, %c0_i32, %c0_i32_0 : i32, i32, i32
  }
}

module attributes {stable_mosaic.version = 11 : i64} {
  func.func @conv1_patches_kernel(%arg0: i32, %arg1: memref<64x1152xbf16, #tpu.memory_space<vmem>>, %arg2: memref<1152x256xbf16, #tpu.memory_space<vmem>>, %arg3: memref<1x256xf32, #tpu.memory_space<vmem>>, %arg4: memref<64x256xbf16, #tpu.memory_space<vmem>>, %arg5: memref<1x8x128xf32, #tpu.memory_space<vmem>>) attributes {dimension_semantics = [#tpu.dimension_semantics<parallel>], iteration_bounds = array<i64: 2>, scalar_prefetch = 0 : i64, scratch_operands = 0 : i64, tpu.core_type = #tpu.core_type<tc>, window_params = [{transform_indices = @transform_0, window_bounds = array<i64: 64, 1152>}, {pipeline_mode = #tpu.pipeline_mode<synchronous>, transform_indices = @transform_1, window_bounds = array<i64: 1152, 256>}, {pipeline_mode = #tpu.pipeline_mode<synchronous>, transform_indices = @transform_2, window_bounds = array<i64: 1, 256>}, {transform_indices = @transform_3, window_bounds = array<i64: 64, 256>}, {transform_indices = @transform_4, window_bounds = array<i64: 1, 8, 128>}]} {
    %c0 = arith.constant 0 : index
    %c0_0 = arith.constant 0 : index
    %0 = vector.load %arg1[%c0, %c0_0] : memref<64x1152xbf16, #tpu.memory_space<vmem>>, vector<64x1152xbf16>
    %c0_1 = arith.constant 0 : index
    %c0_2 = arith.constant 0 : index
    %1 = vector.load %arg2[%c0_1, %c0_2] : memref<1152x256xbf16, #tpu.memory_space<vmem>>, vector<1152x256xbf16>
    %cst = arith.constant dense<0.000000e+00> : vector<64x256xf32>
    %2 = tpu.matmul %0, %1, %cst {dimension_numbers = #tpu.dot_dimension_numbers<[1], [0], [0], [1], [0, 0, 1, 1], [], []>} : vector<64x1152xbf16>, vector<1152x256xbf16>, vector<64x256xf32> -> vector<64x256xf32>
    %c0_3 = arith.constant 0 : index
    %c0_4 = arith.constant 0 : index
    %3 = vector.load %arg3[%c0_3, %c0_4] : memref<1x256xf32, #tpu.memory_space<vmem>>, vector<1x256xf32>
    %4 = vector.broadcast %3 : vector<1x256xf32> to vector<64x256xf32>
    %5 = arith.addf %2, %4 : vector<64x256xf32>
    %6 = arith.truncf %5 : vector<64x256xf32> to vector<64x256xbf16>
    %c0_5 = arith.constant 0 : index
    %c0_6 = arith.constant 0 : index
    %7 = vector.load %arg4[%c0_5, %c0_6] : memref<64x256xbf16, #tpu.memory_space<vmem>>, vector<64x256xbf16>
    tpu.vector_store %arg4[%c0_5, %c0_6], %6 {strides = array<i32>} : memref<64x256xbf16, #tpu.memory_space<vmem>>, vector<64x256xbf16>,
    %8 = vector.extract_strided_slice %5 {offsets = [0, 0], sizes = [64, 128], strides = [1, 1]} : vector<64x256xf32> to vector<64x128xf32>
    %cst_7 = arith.constant dense<0.000000e+00> : vector<128xf32>
    %9 = vector.multi_reduction <add>, %8, %cst_7 [0] : vector<64x128xf32> to vector<128xf32>
    %10 = vector.shape_cast %9 : vector<128xf32> to vector<1x128xf32>
    %11 = arith.mulf %8, %8 : vector<64x128xf32>
    %cst_8 = arith.constant dense<0.000000e+00> : vector<128xf32>
    %12 = vector.multi_reduction <add>, %11, %cst_8 [0] : vector<64x128xf32> to vector<128xf32>
    %13 = vector.shape_cast %12 : vector<128xf32> to vector<1x128xf32>
    %cst_9 = arith.constant 0.000000e+00 : f32
    %14 = vector.broadcast %cst_9 : f32 to vector<6x128xf32>
    %15 = tpu.concatenate %10, %13, %14 in 0 : vector<1x128xf32>, vector<1x128xf32>, vector<6x128xf32> -> vector<8x128xf32>
    %c0_10 = arith.constant 0 : index
    %c0_11 = arith.constant 0 : index
    %c0_12 = arith.constant 0 : index
    %16 = vector.load %arg5[%c0_10, %c0_11, %c0_12] : memref<1x8x128xf32, #tpu.memory_space<vmem>>, vector<1x8x128xf32>
    %17 = vector.shape_cast %16 : vector<1x8x128xf32> to vector<8x128xf32>
    %18 = vector.shape_cast %15 : vector<8x128xf32> to vector<1x8x128xf32>
    tpu.vector_store %arg5[%c0_10, %c0_11, %c0_12], %18 {strides = array<i32>} : memref<1x8x128xf32, #tpu.memory_space<vmem>>, vector<1x8x128xf32>,
    return
  }
  func.func @transform_0(%arg0: i32) -> (i32, i32) {
    %c0_i32 = arith.constant 0 : i32
    %c0_i32_0 = arith.constant 0 : i32
    return %arg0, %c0_i32 : i32, i32
  }
  func.func @transform_1(%arg0: i32) -> (i32, i32) {
    %c0_i32 = arith.constant 0 : i32
    %c0_i32_0 = arith.constant 0 : i32
    %c0_i32_1 = arith.constant 0 : i32
    return %c0_i32, %c0_i32_0 : i32, i32
  }
  func.func @transform_2(%arg0: i32) -> (i32, i32) {
    %c0_i32 = arith.constant 0 : i32
    %c0_i32_0 = arith.constant 0 : i32
    %c0_i32_1 = arith.constant 0 : i32
    return %c0_i32, %c0_i32_0 : i32, i32
  }
  func.func @transform_3(%arg0: i32) -> (i32, i32) {
    %c0_i32 = arith.constant 0 : i32
    %c0_i32_0 = arith.constant 0 : i32
    return %arg0, %c0_i32 : i32, i32
  }
  func.func @transform_4(%arg0: i32) -> (i32, i32, i32) {
    %c0_i32 = arith.constant 0 : i32
    %c0_i32_0 = arith.constant 0 : i32
    %c0_i32_1 = arith.constant 0 : i32
    return %arg0, %c0_i32, %c0_i32_0 : i32, i32, i32
  }
}

module attributes {stable_mosaic.version = 11 : i64} {
  func.func @conv2_kernel(%arg0: i32, %arg1: memref<1x10x10x128xbf16, #tpu.memory_space<vmem>>, %arg2: memref<1152x128xbf16, #tpu.memory_space<vmem>>, %arg3: memref<1x128xf32, #tpu.memory_space<vmem>>, %arg4: memref<1x8x8x128xbf16, #tpu.memory_space<vmem>>, %arg5: memref<1x8x8x128xf32, #tpu.memory_space<vmem>>) attributes {dimension_semantics = [#tpu.dimension_semantics<parallel>], iteration_bounds = array<i64: 2>, scalar_prefetch = 0 : i64, scratch_operands = 0 : i64, tpu.core_type = #tpu.core_type<tc>, window_params = [{transform_indices = @transform_0, window_bounds = array<i64: 1, 10, 10, 128>}, {pipeline_mode = #tpu.pipeline_mode<synchronous>, transform_indices = @transform_1, window_bounds = array<i64: 1152, 128>}, {pipeline_mode = #tpu.pipeline_mode<synchronous>, transform_indices = @transform_2, window_bounds = array<i64: 1, 128>}, {transform_indices = @transform_3, window_bounds = array<i64: 1, 8, 8, 128>}, {transform_indices = @transform_4, window_bounds = array<i64: 1, 8, 8, 128>}]} {
    %c0 = arith.constant 0 : index
    %c0_0 = arith.constant 0 : index
    %c0_1 = arith.constant 0 : index
    %c0_2 = arith.constant 0 : index
    %0 = vector.load %arg1[%c0, %c0_0, %c0_1, %c0_2] : memref<1x10x10x128xbf16, #tpu.memory_space<vmem>>, vector<1x8x8x128xbf16>
    %1 = vector.shape_cast %0 : vector<1x8x8x128xbf16> to vector<8x8x128xbf16>
    %2 = vector.shape_cast %1 : vector<8x8x128xbf16> to vector<64x128xbf16>
    %c0_3 = arith.constant 0 : index
    %c0_4 = arith.constant 0 : index
    %c1 = arith.constant 1 : index
    %c0_5 = arith.constant 0 : index
    %3 = vector.load %arg1[%c0_3, %c0_4, %c1, %c0_5] : memref<1x10x10x128xbf16, #tpu.memory_space<vmem>>, vector<1x8x8x128xbf16>
    %4 = vector.shape_cast %3 : vector<1x8x8x128xbf16> to vector<8x8x128xbf16>
    %5 = vector.shape_cast %4 : vector<8x8x128xbf16> to vector<64x128xbf16>
    %c0_6 = arith.constant 0 : index
    %c0_7 = arith.constant 0 : index
    %c2 = arith.constant 2 : index
    %c0_8 = arith.constant 0 : index
    %6 = vector.load %arg1[%c0_6, %c0_7, %c2, %c0_8] : memref<1x10x10x128xbf16, #tpu.memory_space<vmem>>, vector<1x8x8x128xbf16>
    %7 = vector.shape_cast %6 : vector<1x8x8x128xbf16> to vector<8x8x128xbf16>
    %8 = vector.shape_cast %7 : vector<8x8x128xbf16> to vector<64x128xbf16>
    %c0_9 = arith.constant 0 : index
    %c1_10 = arith.constant 1 : index
    %c0_11 = arith.constant 0 : index
    %c0_12 = arith.constant 0 : index
    %9 = vector.load %arg1[%c0_9, %c1_10, %c0_11, %c0_12] : memref<1x10x10x128xbf16, #tpu.memory_space<vmem>>, vector<1x8x8x128xbf16>
    %10 = vector.shape_cast %9 : vector<1x8x8x128xbf16> to vector<8x8x128xbf16>
    %11 = vector.shape_cast %10 : vector<8x8x128xbf16> to vector<64x128xbf16>
    %c0_13 = arith.constant 0 : index
    %c1_14 = arith.constant 1 : index
    %c1_15 = arith.constant 1 : index
    %c0_16 = arith.constant 0 : index
    %12 = vector.load %arg1[%c0_13, %c1_14, %c1_15, %c0_16] : memref<1x10x10x128xbf16, #tpu.memory_space<vmem>>, vector<1x8x8x128xbf16>
    %13 = vector.shape_cast %12 : vector<1x8x8x128xbf16> to vector<8x8x128xbf16>
    %14 = vector.shape_cast %13 : vector<8x8x128xbf16> to vector<64x128xbf16>
    %c0_17 = arith.constant 0 : index
    %c1_18 = arith.constant 1 : index
    %c2_19 = arith.constant 2 : index
    %c0_20 = arith.constant 0 : index
    %15 = vector.load %arg1[%c0_17, %c1_18, %c2_19, %c0_20] : memref<1x10x10x128xbf16, #tpu.memory_space<vmem>>, vector<1x8x8x128xbf16>
    %16 = vector.shape_cast %15 : vector<1x8x8x128xbf16> to vector<8x8x128xbf16>
    %17 = vector.shape_cast %16 : vector<8x8x128xbf16> to vector<64x128xbf16>
    %c0_21 = arith.constant 0 : index
    %c2_22 = arith.constant 2 : index
    %c0_23 = arith.constant 0 : index
    %c0_24 = arith.constant 0 : index
    %18 = vector.load %arg1[%c0_21, %c2_22, %c0_23, %c0_24] : memref<1x10x10x128xbf16, #tpu.memory_space<vmem>>, vector<1x8x8x128xbf16>
    %19 = vector.shape_cast %18 : vector<1x8x8x128xbf16> to vector<8x8x128xbf16>
    %20 = vector.shape_cast %19 : vector<8x8x128xbf16> to vector<64x128xbf16>
    %c0_25 = arith.constant 0 : index
    %c2_26 = arith.constant 2 : index
    %c1_27 = arith.constant 1 : index
    %c0_28 = arith.constant 0 : index
    %21 = vector.load %arg1[%c0_25, %c2_26, %c1_27, %c0_28] : memref<1x10x10x128xbf16, #tpu.memory_space<vmem>>, vector<1x8x8x128xbf16>
    %22 = vector.shape_cast %21 : vector<1x8x8x128xbf16> to vector<8x8x128xbf16>
    %23 = vector.shape_cast %22 : vector<8x8x128xbf16> to vector<64x128xbf16>
    %c0_29 = arith.constant 0 : index
    %c2_30 = arith.constant 2 : index
    %c2_31 = arith.constant 2 : index
    %c0_32 = arith.constant 0 : index
    %24 = vector.load %arg1[%c0_29, %c2_30, %c2_31, %c0_32] : memref<1x10x10x128xbf16, #tpu.memory_space<vmem>>, vector<1x8x8x128xbf16>
    %25 = vector.shape_cast %24 : vector<1x8x8x128xbf16> to vector<8x8x128xbf16>
    %26 = vector.shape_cast %25 : vector<8x8x128xbf16> to vector<64x128xbf16>
    %27 = tpu.concatenate %2, %5, %8, %11, %14, %17, %20, %23, %26 in 1 : vector<64x128xbf16>, vector<64x128xbf16>, vector<64x128xbf16>, vector<64x128xbf16>, vector<64x128xbf16>, vector<64x128xbf16>, vector<64x128xbf16>, vector<64x128xbf16>, vector<64x128xbf16> -> vector<64x1152xbf16>
    %c0_33 = arith.constant 0 : index
    %c0_34 = arith.constant 0 : index
    %28 = vector.load %arg2[%c0_33, %c0_34] : memref<1152x128xbf16, #tpu.memory_space<vmem>>, vector<1152x128xbf16>
    %cst = arith.constant dense<0.000000e+00> : vector<64x128xf32>
    %29 = tpu.matmul %27, %28, %cst {dimension_numbers = #tpu.dot_dimension_numbers<[1], [0], [0], [1], [0, 0, 1, 1], [], []>} : vector<64x1152xbf16>, vector<1152x128xbf16>, vector<64x128xf32> -> vector<64x128xf32>
    %c0_35 = arith.constant 0 : index
    %c0_36 = arith.constant 0 : index
    %30 = vector.load %arg3[%c0_35, %c0_36] : memref<1x128xf32, #tpu.memory_space<vmem>>, vector<1x128xf32>
    %31 = vector.broadcast %30 : vector<1x128xf32> to vector<64x128xf32>
    %32 = arith.addf %29, %31 : vector<64x128xf32>
    %c0_37 = arith.constant 0 : index
    %c0_38 = arith.constant 0 : index
    %c0_39 = arith.constant 0 : index
    %c0_40 = arith.constant 0 : index
    %33 = vector.load %arg4[%c0_37, %c0_38, %c0_39, %c0_40] : memref<1x8x8x128xbf16, #tpu.memory_space<vmem>>, vector<1x8x8x128xbf16>
    %34 = vector.shape_cast %33 : vector<1x8x8x128xbf16> to vector<8x8x128xbf16>
    %35 = arith.extf %34 : vector<8x8x128xbf16> to vector<8x8x128xf32>
    %36 = vector.shape_cast %35 : vector<8x8x128xf32> to vector<64x128xf32>
    %37 = arith.addf %32, %36 : vector<64x128xf32>
    %38 = vector.shape_cast %37 : vector<64x128xf32> to vector<8x8x128xf32>
    %c0_41 = arith.constant 0 : index
    %c0_42 = arith.constant 0 : index
    %c0_43 = arith.constant 0 : index
    %c0_44 = arith.constant 0 : index
    %39 = vector.load %arg5[%c0_41, %c0_42, %c0_43, %c0_44] : memref<1x8x8x128xf32, #tpu.memory_space<vmem>>, vector<1x8x8x128xf32>
    %40 = vector.shape_cast %39 : vector<1x8x8x128xf32> to vector<8x8x128xf32>
    %41 = vector.shape_cast %38 : vector<8x8x128xf32> to vector<1x8x8x128xf32>
    tpu.vector_store %arg5[%c0_41, %c0_42, %c0_43, %c0_44], %41 {strides = array<i32>} : memref<1x8x8x128xf32, #tpu.memory_space<vmem>>, vector<1x8x8x128xf32>,
    return
  }
  func.func @transform_0(%arg0: i32) -> (i32, i32, i32, i32) {
    %c0_i32 = arith.constant 0 : i32
    %c0_i32_0 = arith.constant 0 : i32
    %c0_i32_1 = arith.constant 0 : i32
    %c0_i32_2 = arith.constant 0 : i32
    return %arg0, %c0_i32, %c0_i32_0, %c0_i32_1 : i32, i32, i32, i32
  }
  func.func @transform_1(%arg0: i32) -> (i32, i32) {
    %c0_i32 = arith.constant 0 : i32
    %c0_i32_0 = arith.constant 0 : i32
    %c0_i32_1 = arith.constant 0 : i32
    return %c0_i32, %c0_i32_0 : i32, i32
  }
  func.func @transform_2(%arg0: i32) -> (i32, i32) {
    %c0_i32 = arith.constant 0 : i32
    %c0_i32_0 = arith.constant 0 : i32
    %c0_i32_1 = arith.constant 0 : i32
    return %c0_i32, %c0_i32_0 : i32, i32
  }
  func.func @transform_3(%arg0: i32) -> (i32, i32, i32, i32) {
    %c0_i32 = arith.constant 0 : i32
    %c0_i32_0 = arith.constant 0 : i32
    %c0_i32_1 = arith.constant 0 : i32
    %c0_i32_2 = arith.constant 0 : i32
    return %arg0, %c0_i32, %c0_i32_0, %c0_i32_1 : i32, i32, i32, i32
  }
  func.func @transform_4(%arg0: i32) -> (i32, i32, i32, i32) {
    %c0_i32 = arith.constant 0 : i32
    %c0_i32_0 = arith.constant 0 : i32
    %c0_i32_1 = arith.constant 0 : i32
    %c0_i32_2 = arith.constant 0 : i32
    return %arg0, %c0_i32, %c0_i32_0, %c0_i32_1 : i32, i32, i32, i32
  }
}

</mosaic_0001>

<bundles_post_ra>
// kernel: basic_block_forward.3
= control target key start
LH: loop header
LB: loop body
LE: loop exit
PB: predicated region body
PF: predicated region fallthrough
CT: control target
= control target key end

     0   :  { %s349_s6 = smov 0   ;;  %s405_s0 = inlined_call_operand.vmem [shape: f32[512,128], index: 0, kind: input, shape index: {}]   ;;  %s406_s1 = inlined_call_operand.vmem [shape: f32[2,8,128], index: 1, kind: output, shape index: {}]  }
   0x1 LB: > { %s355_s7 = sadd.s32 4294967295, %s337_s6   ;;  %p317_p0 = scmp.ge.s32.totalorder %s337_s6, 1  ;;  %s337_s6 = sphi %s349_s6, %s11_s6  }
   0x2   : > { %p88_p1 = scmp.lt.s32.totalorder %s337_s6, 3 }
   0x4   : > { %p89_p2 = pnand %p317_p0, %p88_p1 }
   0x5   : > { %s318_s8 = sshll.u32 (!%p89_p2), %s355_s7, 5  ;;  %p113_p4 = scmp.lt.s32.totalorder (!%p89_p2), %s355_s7, 1  ;;  %vm255_vm0 = vcmask (!%p89_p2), 1040384   ;;  %vm257_vm1 = vcmask (!%p89_p2), 1041408  }
   0x6   : > { %92 = sbr.rel (%p89_p2) target bundleno = 96 (0x60), region = 24  ;;  %p108_p3 = scmp.lt.s32.totalorder (!%p89_p2), %s318_s8, 63 }
   0xd   : > { %s408_s8 = smov (!%p108_p3, %s318_s8), 63  ;;  %s410_s7 = smov (!%p113_p4, %s355_s7), 1 }
   0xe   : > { %s319_s9 = sshll.u32 %s408_s8, 3  ;;  %s320_s13 = sshll.u32 %s410_s7, 3 }
   0xf   : > { %s363_s12 = scalar_lea.vmem %s405_s0, %s319_s9  ;;  %s116_s16 = scalar_lea.vmem %s406_s1, %s320_s13 }
  0x10   : > { %v117_v0 = vld [vmem:[%s363_s12] sm:$0xff]  ;;  %v118_v1 = vld [vmem:[%s363_s12 + $0x8] sm:$0xff]  ;;  %v119_v2 = vld [vmem:[%s363_s12 + $0x10] sm:$0xff] }
  0x11   : > { %v120_v3 = vld [vmem:[%s363_s12 + $0x18] sm:$0xff]  ;;  %v149_v4 = vadd.f32 %v118_v1, %v117_v0  ;;  %v186_v5 = vmul.f32 %v117_v0, %v117_v0  ;;  %v187_v6 = vmul.f32 %v118_v1, %v118_v1  ;;  %v188_v7 = vmul.f32 %v119_v2, %v119_v2  ;;  %v121_v8 = vld [vmem:[%s363_s12 + $0x20] sm:$0xff]  ;;  %v122_v12 = vld [vmem:[%s363_s12 + $0x28] sm:$0xff] }
  0x12   : > { %v189_v10 = vmul.f32 %v120_v3, %v120_v3  ;;  %v190_v14 = vmul.f32 %v121_v8, %v121_v8  ;;  %v123_v16 = vld [vmem:[%s363_s12 + $0x30] sm:$0xff]  ;;  %v191_v18 = vmul.f32 %v122_v12, %v122_v12  ;;  %v124_v20 = vld [vmem:[%s363_s12 + $0x38] sm:$0xff]  ;;  %v125_v24 = vld [vmem:[%s363_s12 + $0x40] sm:$0xff] }
  0x13   : > { %v150_v9 = vadd.f32 %v149_v4, %v119_v2  ;;  %v218_v11 = vadd.f32 %v187_v6, %v186_v5  ;;  %v192_v22 = vmul.f32 %v123_v16, %v123_v16  ;;  %v193_v26 = vmul.f32 %v124_v20, %v124_v20  ;;  %v126_v28 = vld [vmem:[%s363_s12 + $0x48] sm:$0xff]  ;;  %v127_v32 = vld [vmem:[%s363_s12 + $0x50] sm:$0xff]  ;;  %v128_v36 = vld [vmem:[%s363_s12 + $0x58] sm:$0xff] }
  0x14   : > { %v194_v30 = vmul.f32 %v125_v24, %v125_v24  ;;  %v195_v34 = vmul.f32 %v126_v28, %v126_v28  ;;  %v196_v38 = vmul.f32 %v127_v32, %v127_v32  ;;  %v129_v40 = vld [vmem:[%s363_s12 + $0x60] sm:$0xff]  ;;  %v197_v42 = vmul.f32 %v128_v36, %v128_v36  ;;  %v130_v44 = vld [vmem:[%s363_s12 + $0x68] sm:$0xff]  ;;  %v131_v48 = vld [vmem:[%s363_s12 + $0x70] sm:$0xff] }
  0x15   : > { %v151_v13 = vadd.f32 %v150_v9, %v120_v3  ;;  %v219_v15 = vadd.f32 %v218_v11, %v188_v7  ;;  %v198_v46 = vmul.f32 %v129_v40, %v129_v40  ;;  %v199_v50 = vmul.f32 %v130_v44, %v130_v44  ;;  %v132_v52 = vld [vmem:[%s363_s12 + $0x78] sm:$0xff]  ;;  %v133_v56 = vld [vmem:[%s363_s12 + $0x80] sm:$0xff]  ;;  %v134_v60 = vld [vmem:[%s363_s12 + $0x88] sm:$0xff] }
  0x16   : > { %v200_v54 = vmul.f32 %v131_v48, %v131_v48  ;;  %v201_v58 = vmul.f32 %v132_v52, %v132_v52  ;;  %v202_v62 = vmul.f32 %v133_v56, %v133_v56  ;;  %v135_v0 = vld [vmem:[%s363_s12 + $0x90] sm:$0xff]  ;;  %v203_v2 = vmul.f32 %v134_v60, %v134_v60  ;;  %v136_v4 = vld [vmem:[%s363_s12 + $0x98] sm:$0xff] }
  0x17   : > { %v152_v17 = vadd.f32 %v151_v13, %v121_v8  ;;  %v220_v19 = vadd.f32 %v219_v15, %v189_v10  ;;  %v204_v6 = vmul.f32 %v135_v0, %v135_v0  ;;  %v137_v8 = vld [vmem:[%s363_s12 + $0xa0] sm:$0xff]  ;;  %v205_v10 = vmul.f32 %v136_v4, %v136_v4 }
  0x19   : > { %v153_v21 = vadd.f32 %v152_v17, %v122_v12  ;;  %v221_v23 = vadd.f32 %v220_v19, %v190_v14  ;;  %v138_v12 = vld [vmem:[%s363_s12 + $0xa8] sm:$0xff]  ;;  %v206_v14 = vmul.f32 %v137_v8, %v137_v8 }
  0x1b   : > { %v154_v25 = vadd.f32 %v153_v21, %v123_v16  ;;  %v222_v27 = vadd.f32 %v221_v23, %v191_v18  ;;  %v139_v16 = vld [vmem:[%s363_s12 + $0xb0] sm:$0xff]  ;;  %v207_v18 = vmul.f32 %v138_v12, %v138_v12 }
  0x1d   : > { %v155_v29 = vadd.f32 %v154_v25, %v124_v20  ;;  %v223_v31 = vadd.f32 %v222_v27, %v192_v22  ;;  %v140_v20 = vld [vmem:[%s363_s12 + $0xb8] sm:$0xff]  ;;  %v208_v22 = vmul.f32 %v139_v16, %v139_v16 }
  0x1f   : > { %v156_v33 = vadd.f32 %v155_v29, %v125_v24  ;;  %v224_v35 = vadd.f32 %v223_v31, %v193_v26  ;;  %v141_v24 = vld [vmem:[%s363_s12 + $0xc0] sm:$0xff]  ;;  %v209_v26 = vmul.f32 %v140_v20, %v140_v20 }
  0x21   : > { %v157_v37 = vadd.f32 %v156_v33, %v126_v28  ;;  %v225_v39 = vadd.f32 %v224_v35, %v194_v30  ;;  %v142_v28 = vld [vmem:[%s363_s12 + $0xc8] sm:$0xff]  ;;  %v210_v30 = vmul.f32 %v141_v24, %v141_v24 }
  0x23   : > { %v158_v41 = vadd.f32 %v157_v37, %v127_v32  ;;  %v226_v43 = vadd.f32 %v225_v39, %v195_v34  ;;  %v143_v32 = vld [vmem:[%s363_s12 + $0xd0] sm:$0xff]  ;;  %v211_v34 = vmul.f32 %v142_v28, %v142_v28 }
  0x25   : > { %v159_v45 = vadd.f32 %v158_v41, %v128_v36  ;;  %v227_v47 = vadd.f32 %v226_v43, %v196_v38  ;;  %v144_v36 = vld [vmem:[%s363_s12 + $0xd8] sm:$0xff]  ;;  %v212_v38 = vmul.f32 %v143_v32, %v143_v32 }
  0x27   : > { %v160_v49 = vadd.f32 %v159_v45, %v129_v40  ;;  %v228_v51 = vadd.f32 %v227_v47, %v197_v42  ;;  %v145_v40 = vld [vmem:[%s363_s12 + $0xe0] sm:$0xff]  ;;  %v213_v42 = vmul.f32 %v144_v36, %v144_v36 }
  0x29   : > { %v161_v53 = vadd.f32 %v160_v49, %v130_v44  ;;  %v229_v55 = vadd.f32 %v228_v51, %v198_v46  ;;  %v146_v44 = vld [vmem:[%s363_s12 + $0xe8] sm:$0xff]  ;;  %v214_v46 = vmul.f32 %v145_v40, %v145_v40 }
  0x2b   : > { %v162_v57 = vadd.f32 %v161_v53, %v131_v48  ;;  %v230_v59 = vadd.f32 %v229_v55, %v199_v50  ;;  %v147_v48 = vld [vmem:[%s363_s12 + $0xf0] sm:$0xff]  ;;  %v215_v50 = vmul.f32 %v146_v44, %v146_v44 }
  0x2d   : > { %v163_v61 = vadd.f32 %v162_v57, %v132_v52  ;;  %v231_v63 = vadd.f32 %v230_v59, %v200_v54  ;;  %v148_v52 = vld [vmem:[%s363_s12 + $0xf8] sm:$0xff]  ;;  %v216_v54 = vmul.f32 %v147_v48, %v147_v48 }
  0x2e   : > { %v217_v57 = vmul.f32 %v148_v52, %v148_v52 }
  0x2f   : > { %v164_v1 = vadd.f32 %v163_v61, %v133_v56  ;;  %v232_v3 = vadd.f32 %v231_v63, %v201_v58 }
  0x31   : > { %v165_v5 = vadd.f32 %v164_v1, %v134_v60  ;;  %v233_v7 = vadd.f32 %v232_v3, %v202_v62 }
  0x33   : > { %v166_v9 = vadd.f32 %v165_v5, %v135_v0  ;;  %v234_v11 = vadd.f32 %v233_v7, %v203_v2 }
  0x35   : > { %v167_v13 = vadd.f32 %v166_v9, %v136_v4  ;;  %v235_v15 = vadd.f32 %v234_v11, %v204_v6 }
  0x37   : > { %v168_v17 = vadd.f32 %v167_v13, %v137_v8  ;;  %v236_v19 = vadd.f32 %v235_v15, %v205_v10 }
  0x39   : > { %v169_v21 = vadd.f32 %v168_v17, %v138_v12  ;;  %v237_v23 = vadd.f32 %v236_v19, %v206_v14 }
  0x3b   : > { %v170_v25 = vadd.f32 %v169_v21, %v139_v16  ;;  %v238_v27 = vadd.f32 %v237_v23, %v207_v18 }
  0x3d   : > { %v171_v29 = vadd.f32 %v170_v25, %v140_v20  ;;  %v239_v31 = vadd.f32 %v238_v27, %v208_v22 }
  0x3f   : > { %v172_v33 = vadd.f32 %v171_v29, %v141_v24  ;;  %v240_v35 = vadd.f32 %v239_v31, %v209_v26 }
  0x41   : > { %v173_v37 = vadd.f32 %v172_v33, %v142_v28  ;;  %v241_v39 = vadd.f32 %v240_v35, %v210_v30 }
  0x43   : > { %v174_v41 = vadd.f32 %v173_v37, %v143_v32  ;;  %v242_v43 = vadd.f32 %v241_v39, %v211_v34 }
  0x45   : > { %v175_v45 = vadd.f32 %v174_v41, %v144_v36  ;;  %v243_v47 = vadd.f32 %v242_v43, %v212_v38 }
  0x47   : > { %v176_v49 = vadd.f32 %v175_v45, %v145_v40  ;;  %v244_v51 = vadd.f32 %v243_v47, %v213_v42 }
  0x49   : > { %v177_v53 = vadd.f32 %v176_v49, %v146_v44  ;;  %v245_v55 = vadd.f32 %v244_v51, %v214_v46 }
  0x4b   : > { %v178_v56 = vadd.f32 %v177_v53, %v147_v48  ;;  %v246_v58 = vadd.f32 %v245_v55, %v215_v50 }
  0x4d   : > { %v179_v59 = vadd.f32 %v178_v56, %v148_v52  ;;  %v247_v60 = vadd.f32 %v246_v58, %v216_v54 }
  0x4f   : > { %v180_v61 = vrot.slane %v179_v59, 4  ;;  %v248_v62 = vadd.f32 %v247_v60, %v217_v57 }
  0x51   : > { %v181_v63 = vadd.f32 %v180_v61, %v179_v59  ;;  %v249_v0 = vrot.slane %v248_v62, 4 }
  0x53   : > { %v182_v1 = vrot.slane %v181_v63, 2  ;;  %v250_v2 = vadd.f32 %v249_v0, %v248_v62 }
  0x55   : > { %v183_v3 = vadd.f32 %v182_v1, %v181_v63  ;;  %v251_v4 = vrot.slane %v250_v2, 2 }
  0x57   : > { %v184_v5 = vrot.slane %v183_v3, 1  ;;  %v252_v6 = vadd.f32 %v251_v4, %v250_v2 }
  0x59   : > { %v185_v7 = vadd.f32 %v184_v5, %v183_v3  ;;  %v253_v8 = vrot.slane %v252_v6, 1 }
  0x5b   : > { %v254_v9 = vadd.f32 %v253_v8, %v252_v6 }
  0x5d   : > { %v256_v10 = vsel %vm255_vm0, %v185_v7, %v254_v9 }
  0x5e   : > { %v258_v11 = vsel %vm257_vm1, %v256_v10, 0.0 }
  0x5f   : > { %259 = vst [vmem:[%s116_s16] sm:$0xff] %v258_v11 }
  0x60 PF: > { %s11_s6 = sadd.s32 1, %s337_s6  }
  0x61   : > { %p8_p5 = scmp.ge.s32.totalorder %s11_s6, 4  }
  0x63   :  { %10 = sbr.rel (!%p8_p5) target bundleno = 1 (0x1), region = 54 }

// kernel: basic_block_forward.4
= control target key start
LH: loop header
LB: loop body
LE: loop exit
PB: predicated region body
PF: predicated region fallthrough
CT: control target
= control target key end

     0   :  { %s2485_s15 = smov 0   ;;  %s3029_s0 = inlined_call_operand.vmem [shape: bf16[128,1152], index: 0, kind: input, shape index: {}]   ;;  %s3030_s1 = inlined_call_operand.vmem [shape: bf16[1152,256], index: 1, kind: input, shape index: {}]   ;;  %s3031_s2 = inlined_call_operand.vmem [shape: f32[1,256], index: 2, kind: input, shape index: {}]   ;;  %s3032_s3 = inlined_call_operand.vmem [shape: bf16[128,256], index: 3, kind: output, shape index: {0}]   ;;  %s3033_s4 = inlined_call_operand.vmem [shape: f32[2,8,128], index: 4, kind: output, shape index: {1}]  }
   0x1 LB: > { %s2491_s16 = sadd.s32 4294967295, %s2457_s15   ;;  %p1871_p0 = scmp.ge.s32.totalorder %s2457_s15, 1  ;;  %s2457_s15 = sphi %s2485_s15, %s15_s15  }
   0x2   : > { %p167_p1 = scmp.lt.s32.totalorder %s2457_s15, 3 }
   0x4   : > { %p168_p2 = pnand %p1871_p0, %p167_p1 }
   0x5   : > { %v2183_v0 = vld [vmem:[%s3030_s1 + $0x4] ss:$8 sps:$4 sm:$0xff] (!%p168_p2)   ;;  %v2187_v2 = vld [vmem:[%s3030_s1] ss:$8 sps:$4 sm:$0xff] (!%p168_p2)   ;;  %v2189_v4 = vld [vmem:[%s3030_s1 + $0x14] ss:$8 sps:$4 sm:$0xff] (!%p168_p2)  }
   0x6   : > { %171 = sbr.rel (%p168_p2) target bundleno = 418 (0x1a2), region = 32  ;;  %v2185_v1 = vld [vmem:[%s3030_s1 + $0x204] ss:$8 sps:$4 sm:$0xff] (!%p168_p2)   ;;  %1318 = vmatprep.subr.bf16.mxu1 (!%p168_p2), %v2183_v0  ;;  %v2188_v3 = vld [vmem:[%s3030_s1 + $0x200] ss:$8 sps:$4 sm:$0xff] (!%p168_p2)   ;;  %s1872_s29 = sshll.u32 (!%p168_p2), %s2491_s16, 3 }
   0x7   : > { %1464 = vmatprep.subr.bf16.mxu0 (!%p168_p2), %v2185_v1  ;;  %1319 = vmatpush1.bf16.msra.mxu1 (!%p168_p2), %v2187_v2  ;;  %v2191_v5 = vld [vmem:[%s3030_s1 + $0x214] ss:$8 sps:$4 sm:$0xff] (!%p168_p2)   ;;  %v2193_v6 = vld [vmem:[%s3030_s1 + $0x10] ss:$8 sps:$4 sm:$0xff] (!%p168_p2)   ;;  %v2195_v8 = vld [vmem:[%s3030_s1 + $0x24] ss:$8 sps:$4 sm:$0xff] (!%p168_p2)  }
   0x8   : > { %1465 = vmatpush1.bf16.msra.mxu0 (!%p168_p2), %v2188_v3  ;;  %1320 = vmatprep.subr.bf16.mxu1 (!%p168_p2), %v2189_v4  ;;  %v2194_v7 = vld [vmem:[%s3030_s1 + $0x210] ss:$8 sps:$4 sm:$0xff] (!%p168_p2)   ;;  %v2197_v9 = vld [vmem:[%s3030_s1 + $0x224] ss:$8 sps:$4 sm:$0xff] (!%p168_p2)   ;;  %v2199_v10 = vld [vmem:[%s3030_s1 + $0x20] ss:$8 sps:$4 sm:$0xff] (!%p168_p2)  }
   0x9   : > { %1466 = vmatprep.subr.bf16.mxu0 (!%p168_p2), %v2191_v5  ;;  %v2200_v11 = vld [vmem:[%s3030_s1 + $0x220] ss:$8 sps:$4 sm:$0xff] (!%p168_p2)   ;;  %v2201_v12 = vld [vmem:[%s3030_s1 + $0x34] ss:$8 sps:$4 sm:$0xff] (!%p168_p2)   ;;  %v2205_v14 = vld [vmem:[%s3030_s1 + $0x30] ss:$8 sps:$4 sm:$0xff] (!%p168_p2)  }
   0xa   : > { %v2203_v13 = vld [vmem:[%s3030_s1 + $0x234] ss:$8 sps:$4 sm:$0xff] (!%p168_p2)   ;;  %v2206_v15 = vld [vmem:[%s3030_s1 + $0x230] ss:$8 sps:$4 sm:$0xff] (!%p168_p2)   ;;  %v2207_v16 = vld [vmem:[%s3030_s1 + $0x44] ss:$8 sps:$4 sm:$0xff] (!%p168_p2)  }
   0xb   : > { %1321 = vmatpush1.bf16.msra.mxu1 (!%p168_p2), %v2193_v6  ;;  %v2209_v17 = vld [vmem:[%s3030_s1 + $0x244] ss:$8 sps:$4 sm:$0xff] (!%p168_p2)   ;;  %v2211_v18 = vld [vmem:[%s3030_s1 + $0x40] ss:$8 sps:$4 sm:$0xff] (!%p168_p2)   ;;  %v2213_v20 = vld [vmem:[%s3030_s1 + $0x54] ss:$8 sps:$4 sm:$0xff] (!%p168_p2)  }
   0xc   : > { %1467 = vmatpush1.bf16.msra.mxu0 (!%p168_p2), %v2194_v7  ;;  %1322 = vmatprep.subr.bf16.mxu1 (!%p168_p2), %v2195_v8  ;;  %v2212_v19 = vld [vmem:[%s3030_s1 + $0x240] ss:$8 sps:$4 sm:$0xff] (!%p168_p2)   ;;  %v2215_v21 = vld [vmem:[%s3030_s1 + $0x254] ss:$8 sps:$4 sm:$0xff] (!%p168_p2)   ;;  %v2217_v22 = vld [vmem:[%s3030_s1 + $0x50] ss:$8 sps:$4 sm:$0xff] (!%p168_p2)  }
   0xd   : > { %1468 = vmatprep.subr.bf16.mxu0 %v2197_v9  ;;  %v2218_v23 = vld [vmem:[%s3030_s1 + $0x250] ss:$8 sps:$4 sm:$0xff]   ;;  %v2219_v24 = vld [vmem:[%s3030_s1 + $0x64] ss:$8 sps:$4 sm:$0xff]   ;;  %v2223_v26 = vld [vmem:[%s3030_s1 + $0x60] ss:$8 sps:$4 sm:$0xff]  }
   0xe   : > { %v2221_v25 = vld [vmem:[%s3030_s1 + $0x264] ss:$8 sps:$4 sm:$0xff]   ;;  %v2224_v27 = vld [vmem:[%s3030_s1 + $0x260] ss:$8 sps:$4 sm:$0xff]   ;;  %v2225_v28 = vld [vmem:[%s3030_s1 + $0x74] ss:$8 sps:$4 sm:$0xff]  }
   0xf   : > { %1323 = vmatpush1.bf16.msra.mxu1 %v2199_v10  ;;  %v2227_v29 = vld [vmem:[%s3030_s1 + $0x274] ss:$8 sps:$4 sm:$0xff]   ;;  %v2229_v30 = vld [vmem:[%s3030_s1 + $0x70] ss:$8 sps:$4 sm:$0xff]   ;;  %v2231_v32 = vld [vmem:[%s3030_s1 + $0x84] ss:$8 sps:$4 sm:$0xff]  }
  0x10   : > { %1469 = vmatpush1.bf16.msra.mxu0 %v2200_v11  ;;  %1324 = vmatprep.subr.bf16.mxu1 %v2201_v12  ;;  %v2230_v31 = vld [vmem:[%s3030_s1 + $0x270] ss:$8 sps:$4 sm:$0xff]   ;;  %p200_p3 = scmp.lt.s32.totalorder %s1872_s29, 15  ;;  %v2233_v33 = vld [vmem:[%s3030_s1 + $0x284] ss:$8 sps:$4 sm:$0xff]   ;;  %p213_p4 = scmp.lt.s32.totalorder %s2491_s16, 1 }
  0x11   : > { %1470 = vmatprep.subr.bf16.mxu0 %v2203_v13  ;;  %v2235_v34 = vld [vmem:[%s3030_s1 + $0x80] ss:$8 sps:$4 sm:$0xff]   ;;  %v2237_v36 = vld [vmem:[%s3030_s1 + $0x94] ss:$8 sps:$4 sm:$0xff]   ;;  %v2241_v38 = vld [vmem:[%s3030_s1 + $0x90] ss:$8 sps:$4 sm:$0xff]  }
  0x12   : > { %v2236_v35 = vld [vmem:[%s3030_s1 + $0x280] ss:$8 sps:$4 sm:$0xff]   ;;  %s3035_s29 = smov (!%p200_p3, %s1872_s29), 15  ;;  %v2239_v37 = vld [vmem:[%s3030_s1 + $0x294] ss:$8 sps:$4 sm:$0xff]   ;;  %s3037_s16 = smov (!%p213_p4, %s2491_s16), 1 }
  0x13   : > { %1325 = vmatpush1.bf16.msra.mxu1 %v2205_v14  ;;  %v2242_v39 = vld [vmem:[%s3030_s1 + $0x290] ss:$8 sps:$4 sm:$0xff]   ;;  %v2243_v40 = vld [vmem:[%s3030_s1 + $0xa4] ss:$8 sps:$4 sm:$0xff]   ;;  %s2173_s28 = smul.u32 36, %s3035_s29  ;;  %vm1773_vm0 = vcmask 1040384  }
  0x14   : > { %1471 = vmatpush1.bf16.msra.mxu0 %v2206_v15  ;;  %1326 = vmatprep.subr.bf16.mxu1 %v2207_v16  ;;  %v2245_v41 = vld [vmem:[%s3030_s1 + $0x2a4] ss:$8 sps:$4 sm:$0xff]   ;;  %v2247_v42 = vld [vmem:[%s3030_s1 + $0xa0] ss:$8 sps:$4 sm:$0xff]   ;;  %v2249_v44 = vld [vmem:[%s3030_s1 + $0xb4] ss:$8 sps:$4 sm:$0xff]  }
  0x15   : > { %1472 = vmatprep.subr.bf16.mxu0 %v2209_v17  ;;  %v2248_v43 = vld [vmem:[%s3030_s1 + $0x2a0] ss:$8 sps:$4 sm:$0xff]   ;;  %s2637_s14 = scalar_lea.vmem %s3029_s0, %s2173_s28  ;;  %v2251_v45 = vld [vmem:[%s3030_s1 + $0x2b4] ss:$8 sps:$4 sm:$0xff]   ;;  %v2253_v46 = vld [vmem:[%s3030_s1 + $0xb0] ss:$8 sps:$4 sm:$0xff]  }
  0x16   : > { %v2254_v47 = vld [vmem:[%s3030_s1 + $0x2b0] ss:$8 sps:$4 sm:$0xff]   ;;  %v2281_v48 = vld [vmem:[%s2637_s14 + $0x4] ss:$36 sps:$4 sm:$0xff]   ;;  %v2261_v54 = vld [vmem:[%s3030_s1 + $0xd4] ss:$8 sps:$4 sm:$0xff]  }
  0x17   : > { %1327 = vmatpush1.bf16.msra.mxu1 %v2211_v18  ;;  %v2255_v49 = vld [vmem:[%s3030_s1 + $0xc4] ss:$8 sps:$4 sm:$0xff]   ;;  %1350 = vmatprep.mubr.bf16.mxu1 %v2281_v48  ;;  %v2287_v51 = vld [vmem:[%s2637_s14 + $0x14] ss:$36 sps:$4 sm:$0xff]   ;;  %v2259_v52 = vld [vmem:[%s3030_s1 + $0xc0] ss:$8 sps:$4 sm:$0xff]  }
  0x18   : > { %1473 = vmatpush1.bf16.msra.mxu0 %v2212_v19  ;;  %1328 = vmatprep.subr.bf16.mxu1 %v2213_v20  ;;  %v2257_v50 = vld [vmem:[%s3030_s1 + $0x2c4] ss:$8 sps:$4 sm:$0xff]   ;;  %v2260_v53 = vld [vmem:[%s3030_s1 + $0x2c0] ss:$8 sps:$4 sm:$0xff]   ;;  %v2263_v55 = vld [vmem:[%s3030_s1 + $0x2d4] ss:$8 sps:$4 sm:$0xff]  }
  0x19   : > { %1474 = vmatprep.subr.bf16.mxu0 %v2215_v21  ;;  %1496 = vmatprep.mubr.bf16.mxu0 %v2287_v51  ;;  %v2265_v56 = vld [vmem:[%s3030_s1 + $0xd0] ss:$8 sps:$4 sm:$0xff]   ;;  %v2267_v58 = vld [vmem:[%s3030_s1 + $0xe4] ss:$8 sps:$4 sm:$0xff]   ;;  %v2271_v60 = vld [vmem:[%s3030_s1 + $0xe0] ss:$8 sps:$4 sm:$0xff]  }
  0x1a   : > { %v2266_v57 = vld [vmem:[%s3030_s1 + $0x2d0] ss:$8 sps:$4 sm:$0xff]   ;;  %v2269_v59 = vld [vmem:[%s3030_s1 + $0x2e4] ss:$8 sps:$4 sm:$0xff]   ;;  %v2272_v61 = vld [vmem:[%s3030_s1 + $0x2e0] ss:$8 sps:$4 sm:$0xff]  }
  0x1b   : > { %1329 = vmatpush1.bf16.msra.mxu1 %v2217_v22  ;;  %v2273_v62 = vld [vmem:[%s3030_s1 + $0xf4] ss:$8 sps:$4 sm:$0xff]   ;;  %v2277_v0 = vld [vmem:[%s3030_s1 + $0xf0] ss:$8 sps:$4 sm:$0xff]   ;;  %v2284_v2 = vld [vmem:[%s3030_s1 + $0x104] ss:$8 sps:$4 sm:$0xff]  }
  0x1c   : > { %1475 = vmatpush1.bf16.msra.mxu0 %v2218_v23  ;;  %1330 = vmatprep.subr.bf16.mxu1 %v2219_v24  ;;  %v2275_v63 = vld [vmem:[%s3030_s1 + $0x2f4] ss:$8 sps:$4 sm:$0xff]   ;;  %v2278_v1 = vld [vmem:[%s3030_s1 + $0x2f0] ss:$8 sps:$4 sm:$0xff]   ;;  %v2290_v3 = vld [vmem:[%s3030_s1 + $0x304] ss:$8 sps:$4 sm:$0xff]  }
  0x1d   : > { %1476 = vmatprep.subr.bf16.mxu0 %v2221_v25  ;;  %v2279_v4 = vld [vmem:[%s2637_s14] ss:$36 sps:$4 sm:$0xff]   ;;  %v2285_v6 = vld [vmem:[%s2637_s14 + $0x10] ss:$36 sps:$4 sm:$0xff]   ;;  %v2349_v20 = vld [vmem:[%s2637_s14 + $0x48] ss:$36 sps:$4 sm:$0xff]  }
  0x1e   : > { %v2282_v5 = vld [vmem:[%s3030_s1 + $0x100] ss:$8 sps:$4 sm:$0xff]   ;;  %v2293_v8 = vld [vmem:[%s3030_s1 + $0x114] ss:$8 sps:$4 sm:$0xff]   ;;  %v2291_v10 = vld [vmem:[%s3030_s1 + $0x110] ss:$8 sps:$4 sm:$0xff]  }
  0x1f   : > { %1331 = vmatpush1.bf16.msra.mxu1 %v2223_v26  ;;  %v2288_v7 = vld [vmem:[%s3030_s1 + $0x300] ss:$8 sps:$4 sm:$0xff]   ;;  %v2296_v9 = vld [vmem:[%s3030_s1 + $0x314] ss:$8 sps:$4 sm:$0xff]   ;;  %v2294_v11 = vld [vmem:[%s3030_s1 + $0x310] ss:$8 sps:$4 sm:$0xff]  }
  0x20   : > { %1477 = vmatpush1.bf16.msra.mxu0 %v2224_v27  ;;  %1332 = vmatprep.subr.bf16.mxu1 %v2225_v28  ;;  %v2299_v12 = vld [vmem:[%s3030_s1 + $0x124] ss:$8 sps:$4 sm:$0xff]   ;;  %v2297_v14 = vld [vmem:[%s3030_s1 + $0x120] ss:$8 sps:$4 sm:$0xff]   ;;  %v2305_v16 = vld [vmem:[%s3030_s1 + $0x134] ss:$8 sps:$4 sm:$0xff]  }
  0x21   : > { %1478 = vmatprep.subr.bf16.mxu0 %v2227_v29  ;;  %v2302_v13 = vld [vmem:[%s3030_s1 + $0x324] ss:$8 sps:$4 sm:$0xff]   ;;  %v2300_v15 = vld [vmem:[%s3030_s1 + $0x320] ss:$8 sps:$4 sm:$0xff]   ;;  %v2308_v17 = vld [vmem:[%s3030_s1 + $0x334] ss:$8 sps:$4 sm:$0xff]  }
  0x22   : > { %v2345_v18 = vld [vmem:[%s2637_s14 + $0x4c] ss:$36 sps:$4 sm:$0xff]   ;;  %v2347_v19 = vld [vmem:[%s2637_s14 + $0x5c] ss:$36 sps:$4 sm:$0xff]   ;;  %vm1775_vm1 = vcmask 1041408  }
  0x23   : > { %1333 = vmatpush1.bf16.msra.mxu1 %v2229_v30  ;;  %v2303_v21 = vld [vmem:[%s3030_s1 + $0x130] ss:$8 sps:$4 sm:$0xff]   ;;  %v2311_v24 = vld [vmem:[%s3030_s1 + $0x144] ss:$8 sps:$4 sm:$0xff]   ;;  %v2309_v26 = vld [vmem:[%s3030_s1 + $0x140] ss:$8 sps:$4 sm:$0xff]  }
  0x24   : > { %1479 = vmatpush1.bf16.msra.mxu0 %v2230_v31  ;;  %1334 = vmatprep.subr.bf16.mxu1 %v2231_v32  ;;  %v2306_v22 = vld [vmem:[%s3030_s1 + $0x330] ss:$8 sps:$4 sm:$0xff]   ;;  %v2314_v25 = vld [vmem:[%s3030_s1 + $0x344] ss:$8 sps:$4 sm:$0xff]   ;;  %v2312_v27 = vld [vmem:[%s3030_s1 + $0x340] ss:$8 sps:$4 sm:$0xff]  }
  0x25   : > { %1480 = vmatprep.subr.bf16.mxu0 %v2233_v33  ;;  %v2353_v23 = vld [vmem:[%s2637_s14 + $0x58] ss:$36 sps:$4 sm:$0xff]   ;;  %v2365_v31 = vld [vmem:[%s2637_s14 + $0xa4] ss:$36 sps:$4 sm:$0xff]   ;;  %v2367_v32 = vld [vmem:[%s2637_s14 + $0x90] ss:$36 sps:$4 sm:$0xff]  }
  0x26   : > { %v2317_v28 = vld [vmem:[%s3030_s1 + $0x154] ss:$8 sps:$4 sm:$0xff]   ;;  %v2315_v33 = vld [vmem:[%s3030_s1 + $0x150] ss:$8 sps:$4 sm:$0xff]   ;;  %v2335_v48 = vld [vmem:[%s3030_s1 + $0x184] ss:$8 sps:$4 sm:$0xff]  }
  0x27   : > { %1335 = vmatpush1.bf16.msra.mxu1 %v2235_v34  ;;  %v2320_v29 = vld [vmem:[%s3030_s1 + $0x354] ss:$8 sps:$4 sm:$0xff]   ;;  %v2318_v34 = vld [vmem:[%s3030_s1 + $0x350] ss:$8 sps:$4 sm:$0xff]   ;;  %v2336_v51 = vld [vmem:[%s3030_s1 + $0x380] ss:$8 sps:$4 sm:$0xff]  }
  0x28   : > { %1481 = vmatpush1.bf16.msra.mxu0 %v2236_v35  ;;  %1336 = vmatprep.subr.bf16.mxu1 %v2237_v36  ;;  %v2363_v30 = vld [vmem:[%s2637_s14 + $0x94] ss:$36 sps:$4 sm:$0xff]   ;;  %v2371_v35 = vld [vmem:[%s2637_s14 + $0xa0] ss:$36 sps:$4 sm:$0xff]  }
  0x29   : > { %1482 = vmatprep.subr.bf16.mxu0 %v2239_v37  ;;  %v2323_v36 = vld [vmem:[%s3030_s1 + $0x164] ss:$8 sps:$4 sm:$0xff]  }
  0x2a   : > { %v2326_v37 = vld [vmem:[%s3030_s1 + $0x364] ss:$8 sps:$4 sm:$0xff]  }
  0x2b   : > { %1337 = vmatpush1.bf16.msra.mxu1 %v2241_v38  ;;  %v2321_v38 = vld [vmem:[%s3030_s1 + $0x160] ss:$8 sps:$4 sm:$0xff]  }
  0x2c   : > { %1483 = vmatpush1.bf16.msra.mxu0 %v2242_v39  ;;  %1338 = vmatprep.subr.bf16.mxu1 %v2243_v40  ;;  %v2324_v39 = vld [vmem:[%s3030_s1 + $0x360] ss:$8 sps:$4 sm:$0xff]   ;;  %v2329_v40 = vld [vmem:[%s3030_s1 + $0x174] ss:$8 sps:$4 sm:$0xff]  }
  0x2d   : > { %1484 = vmatprep.subr.bf16.mxu0 %v2245_v41  ;;  %v2332_v41 = vld [vmem:[%s3030_s1 + $0x374] ss:$8 sps:$4 sm:$0xff]  }
  0x2f   : > { %1339 = vmatpush1.bf16.msra.mxu1 %v2247_v42  ;;  %v2381_v42 = vld [vmem:[%s2637_s14 + $0xdc] ss:$36 sps:$4 sm:$0xff]  }
  0x30   : > { %1485 = vmatpush1.bf16.msra.mxu0 %v2248_v43  ;;  %1340 = vmatprep.subr.bf16.mxu1 %v2249_v44  ;;  %v2383_v43 = vld [vmem:[%s2637_s14 + $0xec] ss:$36 sps:$4 sm:$0xff]   ;;  %v2385_v44 = vld [vmem:[%s2637_s14 + $0xd8] ss:$36 sps:$4 sm:$0xff]  }
  0x31   : > { %1486 = vmatprep.subr.bf16.mxu0 %v2251_v45  ;;  %v2327_v45 = vld [vmem:[%s3030_s1 + $0x170] ss:$8 sps:$4 sm:$0xff]  }
  0x33   : > { %1341 = vmatpush1.bf16.msra.mxu1 %v2253_v46  ;;  %v2330_v46 = vld [vmem:[%s3030_s1 + $0x370] ss:$8 sps:$4 sm:$0xff]  }
  0x34   : > { %1487 = vmatpush1.bf16.msra.mxu0 %v2254_v47  ;;  %1342 = vmatprep.subr.bf16.mxu1 %v2255_v49  ;;  %v2389_v47 = vld [vmem:[%s2637_s14 + $0xe8] ss:$36 sps:$4 sm:$0xff]  }
  0x35   : > { %1488 = vmatprep.subr.bf16.mxu0 %v2257_v50  ;;  %v2338_v49 = vld [vmem:[%s3030_s1 + $0x384] ss:$8 sps:$4 sm:$0xff]   ;;  %v2333_v50 = vld [vmem:[%s3030_s1 + $0x180] ss:$8 sps:$4 sm:$0xff]  }
  0x37   : > { %1343 = vmatpush1.bf16.msra.mxu1 %v2259_v52  ;;  %v2341_v52 = vld [vmem:[%s3030_s1 + $0x194] ss:$8 sps:$4 sm:$0xff]  }
  0x38   : > { %1489 = vmatpush1.bf16.msra.mxu0 %v2260_v53  ;;  %1344 = vmatprep.subr.bf16.mxu1 %v2261_v54  ;;  %v2344_v53 = vld [vmem:[%s3030_s1 + $0x394] ss:$8 sps:$4 sm:$0xff]   ;;  %v2401_v54 = vld [vmem:[%s2637_s14 + $0xc] ss:$36 sps:$4 sm:$0xff]  }
  0x39   : > { %1490 = vmatprep.subr.bf16.mxu0 %v2263_v55  ;;  %v2404_v55 = vld [vmem:[%s2637_s14 + $0x1c] ss:$36 sps:$4 sm:$0xff]  }
  0x3b   : > { %1345 = vmatpush1.bf16.msra.mxu1 %v2265_v56  ;;  %v2339_v56 = vld [vmem:[%s3030_s1 + $0x190] ss:$8 sps:$4 sm:$0xff]  }
  0x3c   : > { %1491 = vmatpush1.bf16.msra.mxu0 %v2266_v57  ;;  %1346 = vmatprep.subr.bf16.mxu1 %v2267_v58  ;;  %v2342_v57 = vld [vmem:[%s3030_s1 + $0x390] ss:$8 sps:$4 sm:$0xff]   ;;  %v2352_v58 = vld [vmem:[%s3030_s1 + $0x1a4] ss:$8 sps:$4 sm:$0xff]  }
  0x3d   : > { %1492 = vmatprep.subr.bf16.mxu0 %v2269_v59  ;;  %v2356_v59 = vld [vmem:[%s3030_s1 + $0x3a4] ss:$8 sps:$4 sm:$0xff]  }
  0x3f   : > { %1347 = vmatpush1.bf16.msra.mxu1 %v2271_v60  ;;  %v2350_v60 = vld [vmem:[%s3030_s1 + $0x1a0] ss:$8 sps:$4 sm:$0xff]  }
  0x40   : > { %1493 = vmatpush1.bf16.msra.mxu0 %v2272_v61  ;;  %1348 = vmatprep.subr.bf16.mxu1 %v2273_v62  ;;  %v2354_v61 = vld [vmem:[%s3030_s1 + $0x3a0] ss:$8 sps:$4 sm:$0xff]   ;;  %v2359_v62 = vld [vmem:[%s3030_s1 + $0x1b4] ss:$8 sps:$4 sm:$0xff]  }
  0x41   : > { %1494 = vmatprep.subr.bf16.mxu0 %v2275_v63  ;;  %v2362_v63 = vld [vmem:[%s3030_s1 + $0x3b4] ss:$8 sps:$4 sm:$0xff]  }
  0x43   : > { %1349 = vmatpush1.bf16.msra.mxu1 %v2277_v0  ;;  %v2357_v0 = vld [vmem:[%s3030_s1 + $0x1b0] ss:$8 sps:$4 sm:$0xff]  }
  0x44   : > { %1495 = vmatpush1.bf16.msra.mxu0 %v2278_v1  ;;  %1391 = vmatprep.subr.bf16.mxu1 %v2284_v2  ;;  %v2360_v1 = vld [vmem:[%s3030_s1 + $0x3b0] ss:$8 sps:$4 sm:$0xff]   ;;  %v2370_v2 = vld [vmem:[%s3030_s1 + $0x1c4] ss:$8 sps:$4 sm:$0xff]  }
  0x45   : > { %1537 = vmatprep.subr.bf16.mxu0 %v2290_v3  ;;  %v2374_v3 = vld [vmem:[%s3030_s1 + $0x3c4] ss:$8 sps:$4 sm:$0xff]  }
  0x46   : > { %1351 = vmatmul.mubr.bf16.vlgmr.msra.gmra.mrb[0].mxu1 %v2279_v4  ;;  %v2368_v4 = vld [vmem:[%s3030_s1 + $0x1c0] ss:$8 sps:$4 sm:$0xff]  }
  0x47   : > { %1497 = vmatmul.mubr.bf16.vlgmr.msra.gmra.mrb[0].mxu0 %v2285_v6  ;;  %1392 = vmatpush1.bf16.msra.mxu1 %v2282_v5  ;;  %v2372_v5 = vld [vmem:[%s3030_s1 + $0x3c0] ss:$8 sps:$4 sm:$0xff]   ;;  %v2377_v6 = vld [vmem:[%s3030_s1 + $0x1d4] ss:$8 sps:$4 sm:$0xff]  }
  0x48   : > { %1538 = vmatpush1.bf16.msra.mxu0 %v2288_v7  ;;  %1393 = vmatprep.subr.bf16.mxu1 %v2293_v8  ;;  %v2380_v7 = vld [vmem:[%s3030_s1 + $0x3d4] ss:$8 sps:$4 sm:$0xff]   ;;  %v2375_v8 = vld [vmem:[%s3030_s1 + $0x1d0] ss:$8 sps:$4 sm:$0xff]  }
  0x49   : > { %1539 = vmatprep.subr.bf16.mxu0 %v2296_v9  ;;  %1360 = vmatprep.mubr.bf16.mxu1 %v2345_v18  ;;  %v2378_v9 = vld [vmem:[%s3030_s1 + $0x3d0] ss:$8 sps:$4 sm:$0xff]   ;;  %v2407_v18 = vld [vmem:[%s3030_s1 + $0x404] ss:$8 sps:$4 sm:$0xff]  }
  0x4a   : > { %1506 = vmatprep.mubr.bf16.mxu0 %v2347_v19  ;;  %v2399_v19 = vld [vmem:[%s2637_s14 + $0x8] ss:$36 sps:$4 sm:$0xff]  }
  0x4b   : > { %1394 = vmatpush1.bf16.msra.mxu1 %v2291_v10  ;;  %v2388_v10 = vld [vmem:[%s3030_s1 + $0x1e4] ss:$8 sps:$4 sm:$0xff]  }
  0x4c   : > { %1540 = vmatpush1.bf16.msra.mxu0 %v2294_v11  ;;  %1395 = vmatprep.subr.bf16.mxu1 %v2299_v12  ;;  %v2392_v11 = vld [vmem:[%s3030_s1 + $0x3e4] ss:$8 sps:$4 sm:$0xff]   ;;  %v2386_v12 = vld [vmem:[%s3030_s1 + $0x1e0] ss:$8 sps:$4 sm:$0xff]  }
  0x4d   : > { %1541 = vmatprep.subr.bf16.mxu0 %v2302_v13  ;;  %v2390_v13 = vld [vmem:[%s3030_s1 + $0x3e0] ss:$8 sps:$4 sm:$0xff]  }
  0x4e   : > { %1361 = vmatmul.mubr.bf16.gmra.mrb[4].mxu1 %v2349_v20  ;;  %v2402_v20 = vld [vmem:[%s2637_s14 + $0x18] ss:$36 sps:$4 sm:$0xff]  }
  0x4f   : > { %1396 = vmatpush1.bf16.msra.mxu1 %v2297_v14  ;;  %1507 = vmatmul.mubr.bf16.gmra.mrb[4].mxu0 %v2353_v23  ;;  %v2395_v14 = vld [vmem:[%s3030_s1 + $0x1f4] ss:$8 sps:$4 sm:$0xff]  }
  0x50   : > { %1542 = vmatpush1.bf16.msra.mxu0 %v2300_v15  ;;  %1397 = vmatprep.subr.bf16.mxu1 %v2305_v16  ;;  %v2398_v15 = vld [vmem:[%s3030_s1 + $0x3f4] ss:$8 sps:$4 sm:$0xff]   ;;  %v2393_v16 = vld [vmem:[%s3030_s1 + $0x1f0] ss:$8 sps:$4 sm:$0xff]  }
  0x51   : > { %1543 = vmatprep.subr.bf16.mxu0 %v2308_v17  ;;  %1370 = vmatprep.mubr.bf16.mxu1 %v2363_v30  ;;  %v2396_v17 = vld [vmem:[%s3030_s1 + $0x3f0] ss:$8 sps:$4 sm:$0xff]   ;;  %v2422_v30 = vld [vmem:[%s3030_s1 + $0x434] ss:$8 sps:$4 sm:$0xff]  }
  0x52   : > { %1516 = vmatprep.mubr.bf16.mxu0 %v2365_v31  ;;  %v2411_v23 = vld [vmem:[%s2637_s14 + $0x54] ss:$36 sps:$4 sm:$0xff]   ;;  %v2423_v31 = vld [vmem:[%s2637_s14 + $0x9c] ss:$36 sps:$4 sm:$0xff]  }
  0x53   : > { %1398 = vmatpush1.bf16.msra.mxu1 %v2303_v21  ;;  %v2405_v21 = vld [vmem:[%s3030_s1 + $0x400] ss:$8 sps:$4 sm:$0xff]  }
  0x54   : > { %1544 = vmatpush1.bf16.msra.mxu0 %v2306_v22  ;;  %1399 = vmatprep.subr.bf16.mxu1 %v2311_v24  ;;  %v2410_v22 = vld [vmem:[%s3030_s1 + $0x414] ss:$8 sps:$4 sm:$0xff]   ;;  %v2413_v24 = vld [vmem:[%s2637_s14 + $0x64] ss:$36 sps:$4 sm:$0xff]  }
  0x55   : > { %1545 = vmatprep.subr.bf16.mxu0 %v2314_v25  ;;  %v2408_v25 = vld [vmem:[%s3030_s1 + $0x410] ss:$8 sps:$4 sm:$0xff]  }
  0x56   : > { %1371 = vmatmul.mubr.bf16.gmra.mrb[8].mxu1 %v2367_v32  ;;  %v2425_v32 = vld [vmem:[%s2637_s14 + $0xac] ss:$36 sps:$4 sm:$0xff]  }
  0x57   : > { %1400 = vmatpush1.bf16.msra.mxu1 %v2309_v26  ;;  %1517 = vmatmul.mubr.bf16.gmra.mrb[8].mxu0 %v2371_v35  ;;  %v2419_v26 = vld [vmem:[%s3030_s1 + $0x424] ss:$8 sps:$4 sm:$0xff]   ;;  %v2427_v35 = vld [vmem:[%s2637_s14 + $0x98] ss:$36 sps:$4 sm:$0xff]  }
  0x58   : > { %1546 = vmatpush1.bf16.msra.mxu0 %v2312_v27  ;;  %1401 = vmatprep.subr.bf16.mxu1 %v2317_v28  ;;  %v2415_v27 = vld [vmem:[%s2637_s14 + $0x50] ss:$36 sps:$4 sm:$0xff]   ;;  %v2416_v28 = vld [vmem:[%s2637_s14 + $0x60] ss:$36 sps:$4 sm:$0xff]  }
  0x59   : > { %1547 = vmatprep.subr.bf16.mxu0 %v2320_v29  ;;  %1380 = vmatprep.mubr.bf16.mxu1 %v2381_v42  ;;  %v2417_v29 = vld [vmem:[%s3030_s1 + $0x420] ss:$8 sps:$4 sm:$0xff]   ;;  %v2443_v42 = vld [vmem:[%s3030_s1 + $0x464] ss:$8 sps:$4 sm:$0xff]  }
  0x5a   : > { %1526 = vmatprep.mubr.bf16.mxu0 %v2383_v43  ;;  %v2439_v43 = vld [vmem:[%s2637_s14 + $0xe0] ss:$36 sps:$4 sm:$0xff]  }
  0x5b   : > { %1402 = vmatpush1.bf16.msra.mxu1 %v2315_v33  ;;  %v2420_v33 = vld [vmem:[%s3030_s1 + $0x430] ss:$8 sps:$4 sm:$0xff]  }
  0x5c   : > { %1548 = vmatpush1.bf16.msra.mxu0 %v2318_v34  ;;  %1403 = vmatprep.subr.bf16.mxu1 %v2323_v36  ;;  %v2431_v34 = vld [vmem:[%s3030_s1 + $0x444] ss:$8 sps:$4 sm:$0xff]  }
  0x5d   : > { %1549 = vmatprep.subr.bf16.mxu0 %v2326_v37  ;;  %v2428_v36 = vld [vmem:[%s2637_s14 + $0xa8] ss:$36 sps:$4 sm:$0xff]  }
  0x5e   : > { %1381 = vmatmul.mubr.bf16.gmra.mrb[12].mxu1 %v2385_v44  ;;  %v2429_v37 = vld [vmem:[%s3030_s1 + $0x440] ss:$8 sps:$4 sm:$0xff]   ;;  %v2440_v44 = vld [vmem:[%s2637_s14 + $0xf0] ss:$36 sps:$4 sm:$0xff]  }
  0x5f   : > { %1404 = vmatpush1.bf16.msra.mxu1 %v2321_v38  ;;  %1527 = vmatmul.mubr.bf16.gmra.mrb[12].mxu0 %v2389_v47  ;;  %v2434_v38 = vld [vmem:[%s3030_s1 + $0x454] ss:$8 sps:$4 sm:$0xff]   ;;  %v2444_v47 = vld [vmem:[%s3030_s1 + $0x470] ss:$8 sps:$4 sm:$0xff]  }
  0x60   : > { %1550 = vmatpush1.bf16.msra.mxu0 %v2324_v39  ;;  %1405 = vmatprep.subr.bf16.mxu1 %v2329_v40  ;;  %v2435_v39 = vld [vmem:[%s2637_s14 + $0xe4] ss:$36 sps:$4 sm:$0xff]   ;;  %v2437_v40 = vld [vmem:[%s2637_s14 + $0xf4] ss:$36 sps:$4 sm:$0xff]  }
  0x61   : > { %1551 = vmatprep.subr.bf16.mxu0 %v2332_v41  ;;  %1423 = vmatprep.mubr.bf16.mxu1 %v2401_v54  ;;  %v2432_v41 = vld [vmem:[%s3030_s1 + $0x450] ss:$8 sps:$4 sm:$0xff]  }
  0x62   : > { %1569 = vmatprep.mubr.bf16.mxu0 %v2404_v55 }
  0x63   : > { %1406 = vmatpush1.bf16.msra.mxu1 %v2327_v45  ;;  %v2441_v45 = vld [vmem:[%s3030_s1 + $0x460] ss:$8 sps:$4 sm:$0xff]  }
  0x64   : > { %1552 = vmatpush1.bf16.msra.mxu0 %v2330_v46  ;;  %1407 = vmatprep.subr.bf16.mxu1 %v2335_v48  ;;  %v2446_v46 = vld [vmem:[%s3030_s1 + $0x474] ss:$8 sps:$4 sm:$0xff]   ;;  %v2459_v48 = vmov 0  }
  0x65   : > { %1553 = vmatprep.subr.bf16.mxu0 %v2338_v49  ;;  %v2447_v49 = vld [vmem:[%s2637_s14 + $0x20] ss:$36 sps:$4 sm:$0xff]  }
  0x67   : > { %1408 = vmatpush1.bf16.msra.mxu1 %v2333_v50  ;;  %v2448_v50 = vld [vmem:[%s2637_s14 + $0xb0] ss:$36 sps:$4 sm:$0xff]  }
  0x68   : > { %1554 = vmatpush1.bf16.msra.mxu0 %v2336_v51  ;;  %1409 = vmatprep.subr.bf16.mxu1 %v2341_v52  ;;  %v2449_v51 = vld [vmem:[%s2637_s14 + $0x68] ss:$36 sps:$4 sm:$0xff]   ;;  %v2450_v52 = vld [vmem:[%s2637_s14 + $0xf8] ss:$36 sps:$4 sm:$0xff]   ;;  %s2068_s14 = sshll.u32 %s3035_s29, 3  ;;  %s1877_s29 = sshll.u32 %s3037_s16, 3 }
  0x69   : > { %1555 = vmatprep.subr.bf16.mxu0 %v2344_v53  ;;  %s3003_s21 = scalar_lea.vmem %s3032_s3, %s2068_s14  ;;  %s216_s24 = scalar_lea.vmem %s3033_s4, %s1877_s29 }
  0x6b   : > { %1410 = vmatpush1.bf16.msra.mxu1 %v2339_v56  ;;  %v404_v56 = vlaneseq }
  0x6c   : > { %1556 = vmatpush1.bf16.msra.mxu0 %v2342_v57  ;;  %1411 = vmatprep.subr.bf16.mxu1 %v2352_v58 }
  0x6d   : > { %1557 = vmatprep.subr.bf16.mxu0 %v2356_v59  ;;  %v405_v58 = vshrl.u32 %v404_v56, 7 }
  0x6f   : > { %1412 = vmatpush1.bf16.msra.mxu1 %v2350_v60 }
  0x70   : > { %1558 = vmatpush1.bf16.msra.mxu0 %v2354_v61  ;;  %1413 = vmatprep.subr.bf16.mxu1 %v2359_v62  ;;  %v406_v62 = vsub.s32 0, %v405_v58 }
  0x71   : > { %1559 = vmatprep.subr.bf16.mxu0 %v2362_v63 }
  0x73   : > { %1414 = vmatpush1.bf16.msra.mxu1 %v2357_v0  ;;  %v402_v0 = vld [vmem:[%s3031_s2] sm:$0x3] }
  0x74   : > { %1560 = vmatpush1.bf16.msra.mxu0 %v2360_v1  ;;  %1415 = vmatprep.subr.bf16.mxu1 %v2370_v2  ;;  %v410_v1 = vsub.s32 1, %v405_v58  ;;  %v2983_v2 = vrot.slane %v402_v0, %v406_v62 }
  0x75   : > { %1561 = vmatprep.subr.bf16.mxu0 %v2374_v3 }
  0x76   : > { %v2985_v3 = vrot.slane %v402_v0, %v410_v1 }
  0x77   : > { %1416 = vmatpush1.bf16.msra.mxu1 %v2368_v4 }
  0x78   : > { %1562 = vmatpush1.bf16.msra.mxu0 %v2372_v5  ;;  %1417 = vmatprep.subr.bf16.mxu1 %v2377_v6 }
  0x79   : > { %1563 = vmatprep.subr.bf16.mxu0 %v2380_v7 }
  0x7b   : > { %1418 = vmatpush1.bf16.msra.mxu1 %v2375_v8 }
  0x7c   : > { %1564 = vmatpush1.bf16.msra.mxu0 %v2378_v9  ;;  %1419 = vmatprep.subr.bf16.mxu1 %v2388_v10 }
  0x7d   : > { %1565 = vmatprep.subr.bf16.mxu0 %v2392_v11 }
  0x7f   : > { %1420 = vmatpush1.bf16.msra.mxu1 %v2386_v12 }
  0x80   : > { %1566 = vmatpush1.bf16.msra.mxu0 %v2390_v13  ;;  %1421 = vmatprep.subr.bf16.mxu1 %v2395_v14 }
  0x81   : > { %1567 = vmatprep.subr.bf16.mxu0 %v2398_v15 }
  0x83   : > { %1422 = vmatpush1.bf16.msra.mxu1 %v2393_v16 }
  0x84   : > { %1568 = vmatpush1.bf16.msra.mxu0 %v2396_v17  ;;  %2077 = vmatprep.subr.bf16.mxu1 %v2407_v18 }
  0x85   : > { %1610 = vmatprep.subr.bf16.mxu0 %v2407_v18 }
  0x86   : > { %1424 = vmatmul.mubr.bf16.vlgmr.msra.gmra.mrb[0].mxu1 %v2399_v19 }
  0x87   : > { %1570 = vmatmul.mubr.bf16.vlgmr.msra.gmra.mrb[0].mxu0 %v2402_v20  ;;  %2085 = vmatpush1.bf16.msra.mxu1 %v2405_v21 }
  0x88   : > { %1611 = vmatpush1.bf16.msra.mxu0 %v2405_v21  ;;  %2078 = vmatprep.subr.bf16.mxu1 %v2410_v22 }
  0x89   : > { %1612 = vmatprep.subr.bf16.mxu0 %v2410_v22  ;;  %1433 = vmatprep.mubr.bf16.mxu1 %v2411_v23 }
  0x8a   : > { %1579 = vmatprep.mubr.bf16.mxu0 %v2413_v24 }
  0x8b   : > { %2086 = vmatpush1.bf16.msra.mxu1 %v2408_v25 }
  0x8c   : > { %1613 = vmatpush1.bf16.msra.mxu0 %v2408_v25  ;;  %2079 = vmatprep.subr.bf16.mxu1 %v2419_v26 }
  0x8d   : > { %1614 = vmatprep.subr.bf16.mxu0 %v2419_v26 }
  0x8e   : > { %1434 = vmatmul.mubr.bf16.gmra.mrb[4].mxu1 %v2415_v27 }
  0x8f   : > { %1580 = vmatmul.mubr.bf16.gmra.mrb[4].mxu0 %v2416_v28  ;;  %2087 = vmatpush1.bf16.msra.mxu1 %v2417_v29 }
  0x90   : > { %1615 = vmatpush1.bf16.msra.mxu0 %v2417_v29  ;;  %2080 = vmatprep.subr.bf16.mxu1 %v2422_v30 }
  0x91   : > { %1616 = vmatprep.subr.bf16.mxu0 %v2422_v30  ;;  %1443 = vmatprep.mubr.bf16.mxu1 %v2423_v31 }
  0x92   : > { %1589 = vmatprep.mubr.bf16.mxu0 %v2425_v32 }
  0x93   : > { %2088 = vmatpush1.bf16.msra.mxu1 %v2420_v33 }
  0x94   : > { %1617 = vmatpush1.bf16.msra.mxu0 %v2420_v33  ;;  %2081 = vmatprep.subr.bf16.mxu1 %v2431_v34 }
  0x95   : > { %1618 = vmatprep.subr.bf16.mxu0 %v2431_v34 }
  0x96   : > { %1444 = vmatmul.mubr.bf16.gmra.mrb[8].mxu1 %v2427_v35 }
  0x97   : > { %1590 = vmatmul.mubr.bf16.gmra.mrb[8].mxu0 %v2428_v36  ;;  %2089 = vmatpush1.bf16.msra.mxu1 %v2429_v37 }
  0x98   : > { %1619 = vmatpush1.bf16.msra.mxu0 %v2429_v37  ;;  %2082 = vmatprep.subr.bf16.mxu1 %v2434_v38 }
  0x99   : > { %1620 = vmatprep.subr.bf16.mxu0 %v2434_v38  ;;  %1453 = vmatprep.mubr.bf16.mxu1 %v2435_v39 }
  0x9a   : > { %1599 = vmatprep.mubr.bf16.mxu0 %v2437_v40 }
  0x9b   : > { %2090 = vmatpush1.bf16.msra.mxu1 %v2432_v41 }
  0x9c   : > { %1621 = vmatpush1.bf16.msra.mxu0 %v2432_v41  ;;  %2083 = vmatprep.subr.bf16.mxu1 %v2443_v42 }
  0x9d   : > { %1622 = vmatprep.subr.bf16.mxu0 %v2443_v42 }
  0x9e   : > { %1454 = vmatmul.mubr.bf16.gmra.mrb[12].mxu1 %v2439_v43 }
  0x9f   : > { %1600 = vmatmul.mubr.bf16.gmra.mrb[12].mxu0 %v2440_v44  ;;  %2091 = vmatpush1.bf16.msra.mxu1 %v2441_v45 }
  0xa0   : > { %1623 = vmatpush1.bf16.msra.mxu0 %v2441_v45  ;;  %2084 = vmatprep.subr.bf16.mxu1 %v2446_v46 }
  0xa1   : > { %1624 = vmatprep.subr.bf16.mxu0 %v2446_v46  ;;  %1642 = vmatprep.mubr.bf16.mxu0 %v2459_v48 }
  0xa2   : > { %1662 = vmatprep.mubr.bf16.mxu1 %v2459_v48 }
  0xa3   : > { %2092 = vmatpush1.bf16.msra.mxu1 %v2444_v47 }
  0xa4   : > { %1625 = vmatpush1.bf16.msra.mxu0 %v2444_v47 }
  0xa6   : > { %1663 = vmatmul.mubr.bf16.vlgmr.msra.gmra.mrb[16].mxu1 %v2448_v50 }
  0xa7   : > { %1643 = vmatmul.mubr.bf16.vlgmr.msra.gmra.mrb[0].mxu0 %v2447_v49  ;;  %1672 = vmatprep.mubr.bf16.mxu1 %v2459_v48 }
  0xa8   : > { %1652 = vmatprep.mubr.bf16.mxu0 %v2459_v48 }
  0xae   : > { %1673 = vmatmul.mubr.bf16.gmra.mrb[20].mxu1 %v2450_v52 }
  0xaf   : > { %1653 = vmatmul.mubr.bf16.gmra.mrb[4].mxu0 %v2449_v51 }
 0x159   : > { %v1425_v53 = vpop.f32.mrb[0].mxu1 }
 0x15a   : > { %v1427_v54 = vpop.f32.mrb[1].mxu1  ;;  %v2093_v36 = vadd.f32 %v1425_v53, %v2983_v2 }
 0x15b   : > { %v1429_v55 = vpop.f32.mrb[2].mxu1  ;;  %v2095_v37 = vadd.f32 %v1427_v54, %v2985_v3 }
 0x15c   : > { %v1431_v57 = vpop.f32.mrb[3].mxu1  ;;  %v2097_v40 = vadd.f32 %v1429_v55, %v2983_v2 }
 0x15d   : > { %v2099_v45 = vadd.f32 %v1431_v57, %v2985_v3 }
 0x161   : > { %v2972_v59 = vpop.f32.mrb[4].mxu1 }
 0x162   : > { %v2974_v60 = vpop.f32.mrb[5].mxu1 }
 0x163   : > { %v2976_v61 = vpop.f32.mrb[6].mxu1 }
 0x164   : > { %v2978_v63 = vpop.f32.mrb[7].mxu1 }
 0x169   : > { %v1445_v4 = vpop.f32.mrb[8].mxu1 }
 0x16a   : > { %v1591_v5 = vpop.f32.mrb[8].mxu0  ;;  %v2109_v6 = vadd.f32 %v1445_v4, %v2983_v2  ;;  %v1447_v7 = vpop.f32.mrb[9].mxu1 }
 0x16b   : > { %v1593_v8 = vpop.f32.mrb[9].mxu0  ;;  %v2112_v9 = vadd.f32 %v1447_v7, %v2985_v3  ;;  %v1449_v10 = vpop.f32.mrb[10].mxu1  ;;  %v2103_v7 = vadd.f32 %v2974_v60, %v2985_v3 }
 0x16c   : > { %v1595_v11 = vpop.f32.mrb[10].mxu0  ;;  %v2110_v12 = vadd.f32 %v2109_v6, %v1591_v5  ;;  %v2115_v13 = vadd.f32 %v1449_v10, %v2983_v2  ;;  %v1451_v14 = vpop.f32.mrb[11].mxu1  ;;  %v2101_v5 = vadd.f32 %v2972_v59, %v2983_v2  ;;  %v2105_v10 = vadd.f32 %v2976_v61, %v2983_v2 }
 0x16d   : > { %v1597_v15 = vpop.f32.mrb[11].mxu0  ;;  %v2113_v16 = vadd.f32 %v2112_v9, %v1593_v8  ;;  %v2118_v17 = vadd.f32 %v1451_v14, %v2985_v3 }
 0x16e   : > { %v2116_v18 = vadd.f32 %v2115_v13, %v1595_v11 }
 0x16f   : > { %v2119_v19 = vadd.f32 %v2118_v17, %v1597_v15  ;;  %v2107_v15 = vadd.f32 %v2978_v63, %v2985_v3 }
 0x171   : > { %v1455_v20 = vpop.f32.mrb[12].mxu1 }
 0x172   : > { %v1601_v21 = vpop.f32.mrb[12].mxu0  ;;  %v2121_v22 = vadd.f32 %v1455_v20, %v2983_v2  ;;  %v1457_v23 = vpop.f32.mrb[13].mxu1 }
 0x173   : > { %v1603_v24 = vpop.f32.mrb[13].mxu0  ;;  %v2124_v25 = vadd.f32 %v1457_v23, %v2985_v3  ;;  %v1459_v26 = vpop.f32.mrb[14].mxu1 }
 0x174   : > { %v1605_v27 = vpop.f32.mrb[14].mxu0  ;;  %v2122_v28 = vadd.f32 %v2121_v22, %v1601_v21  ;;  %v2127_v29 = vadd.f32 %v1459_v26, %v2983_v2  ;;  %v1461_v30 = vpop.f32.mrb[15].mxu1 }
 0x175   : > { %v1607_v31 = vpop.f32.mrb[15].mxu0  ;;  %v2125_v32 = vadd.f32 %v2124_v25, %v1603_v24  ;;  %v2130_v33 = vadd.f32 %v1461_v30, %v2985_v3 }
 0x176   : > { %v2128_v34 = vadd.f32 %v2127_v29, %v1605_v27 }
 0x177   : > { %v2131_v35 = vadd.f32 %v2130_v33, %v1607_v31 }
 0x179   : > { %v1664_v39 = vpop.f32.mrb[16].mxu1 }
 0x17a   : > { %v1644_v38 = vpop.f32.mrb[0].mxu0  ;;  %v2111_v42 = vadd.f32 %v2110_v12, %v1664_v39  ;;  %v1666_v44 = vpop.f32.mrb[17].mxu1 }
 0x17b   : > { %v2094_v41 = vadd.f32 %v2093_v36, %v1644_v38  ;;  %v1646_v43 = vpop.f32.mrb[1].mxu0  ;;  %v2114_v47 = vadd.f32 %v2113_v16, %v1666_v44  ;;  %v1668_v49 = vpop.f32.mrb[18].mxu1 }
 0x17c   : > { %v2096_v46 = vadd.f32 %v2095_v37, %v1646_v43  ;;  %v1648_v48 = vpop.f32.mrb[2].mxu0  ;;  %v2117_v51 = vadd.f32 %v2116_v18, %v1668_v49  ;;  %v1670_v53 = vpop.f32.mrb[19].mxu1 }
 0x17d   : > { %v2098_v50 = vadd.f32 %v2097_v40, %v1648_v48  ;;  %v1650_v52 = vpop.f32.mrb[3].mxu0  ;;  %v2073_v55 = vpack.c.bf16 %v2114_v47, %v2111_v42  ;;  %v2120_v57 = vadd.f32 %v2119_v19, %v1670_v53  ;;  %v1752_v58 = vmul.f32 %v2094_v41, %v2094_v41 }
 0x17e   : > { %v2069_v54 = vpack.c.bf16 %v2096_v46, %v2094_v41  ;;  %v2100_v56 = vadd.f32 %v2099_v45, %v1650_v52 }
 0x17f   : > { %v1739_v62 = vadd.f32 %v2098_v50, %v2094_v41  ;;  %v1753_v0 = vmul.f32 %v2098_v50, %v2098_v50  ;;  %1735 = vst [vmem:[%s3003_s21 + $0x20] sm:$0xff] %v2073_v55  ;;  %v2074_v4 = vpack.c.bf16 %v2120_v57, %v2117_v51 }
 0x180   : > { %1731 = vst [vmem:[%s3003_s21] sm:$0xff] %v2069_v54  ;;  %v2070_v1 = vpack.c.bf16 %v2100_v56, %v2098_v50 }
 0x181   : > { %v1760_v6 = vadd.f32 %v1753_v0, %v1752_v58  ;;  %1736 = vst [vmem:[%s3003_s21 + $0x28] sm:$0xff] %v2074_v4  ;;  %v1674_v9 = vpop.f32.mrb[20].mxu1 }
 0x182   : > { %1732 = vst [vmem:[%s3003_s21 + $0x8] sm:$0xff] %v2070_v1  ;;  %v1654_v8 = vpop.f32.mrb[4].mxu0  ;;  %v2123_v12 = vadd.f32 %v2122_v28, %v1674_v9  ;;  %v1676_v14 = vpop.f32.mrb[21].mxu1  ;;  %v1756_v28 = vmul.f32 %v2111_v42, %v2111_v42 }
 0x183   : > { %v2102_v11 = vadd.f32 %v2101_v5, %v1654_v8  ;;  %v1656_v13 = vpop.f32.mrb[5].mxu0  ;;  %v2126_v59 = vadd.f32 %v2125_v32, %v1676_v14  ;;  %v1678_v60 = vpop.f32.mrb[22].mxu1  ;;  %v1757_v32 = vmul.f32 %v2117_v51, %v2117_v51 }
 0x184   : > { %v2104_v16 = vadd.f32 %v2103_v7, %v1656_v13  ;;  %v1658_v17 = vpop.f32.mrb[6].mxu0  ;;  %v1680_v22 = vpop.f32.mrb[23].mxu1  ;;  %v2129_v23 = vadd.f32 %v2128_v34, %v1678_v60  ;;  %v1758_v34 = vmul.f32 %v2123_v12, %v2123_v12 }
 0x185   : > { %v1740_v18 = vadd.f32 %v2102_v11, %v1739_v62  ;;  %v1754_v19 = vmul.f32 %v2102_v11, %v2102_v11  ;;  %v2106_v20 = vadd.f32 %v2105_v10, %v1658_v17  ;;  %v1660_v21 = vpop.f32.mrb[7].mxu0  ;;  %v2075_v2 = vpack.c.bf16 %v2126_v59, %v2123_v12 }
 0x186   : > { %v2071_v61 = vpack.c.bf16 %v2104_v16, %v2102_v11  ;;  %v2108_v24 = vadd.f32 %v2107_v15, %v1660_v21  ;;  %v2132_v3 = vadd.f32 %v2131_v35, %v1680_v22  ;;  %v1759_v40 = vmul.f32 %v2129_v23, %v2129_v23 }
 0x187   : > { %v1761_v25 = vadd.f32 %v1760_v6, %v1754_v19  ;;  %v1741_v26 = vadd.f32 %v2106_v20, %v1740_v18  ;;  %v1755_v63 = vmul.f32 %v2106_v20, %v2106_v20  ;;  %1737 = vst [vmem:[%s3003_s21 + $0x30] sm:$0xff] %v2075_v2 }
 0x188   : > { %1733 = vst [vmem:[%s3003_s21 + $0x10] sm:$0xff] %v2071_v61  ;;  %v2072_v27 = vpack.c.bf16 %v2108_v24, %v2106_v20  ;;  %v2076_v31 = vpack.c.bf16 %v2132_v3, %v2129_v23 }
 0x189   : > { %v1742_v29 = vadd.f32 %v2111_v42, %v1741_v26  ;;  %v1762_v30 = vadd.f32 %v1761_v25, %v1755_v63 }
 0x18a   : > { %1734 = vst [vmem:[%s3003_s21 + $0x18] sm:$0xff] %v2072_v27  ;;  %1738 = vst [vmem:[%s3003_s21 + $0x38] sm:$0xff] %v2076_v31 }
 0x18b   : > { %v1763_v33 = vadd.f32 %v1762_v30, %v1756_v28  ;;  %v1743_v36 = vadd.f32 %v2117_v51, %v1742_v29 }
 0x18d   : > { %v1744_v37 = vadd.f32 %v2123_v12, %v1743_v36  ;;  %v1764_v38 = vadd.f32 %v1763_v33, %v1757_v32 }
 0x18f   : > { %v1745_v39 = vadd.f32 %v2129_v23, %v1744_v37  ;;  %v1765_v35 = vadd.f32 %v1764_v38, %v1758_v34 }
 0x191   : > { %v1746_v41 = vrot.slane %v1745_v39, 4  ;;  %v1766_v43 = vadd.f32 %v1765_v35, %v1759_v40 }
 0x193   : > { %v1747_v44 = vadd.f32 %v1746_v41, %v1745_v39  ;;  %v1767_v42 = vrot.slane %v1766_v43, 4 }
 0x195   : > { %v1748_v45 = vrot.slane %v1747_v44, 2  ;;  %v1768_v46 = vadd.f32 %v1767_v42, %v1766_v43 }
 0x197   : > { %v1749_v47 = vadd.f32 %v1748_v45, %v1747_v44  ;;  %v1769_v48 = vrot.slane %v1768_v46, 2 }
 0x199   : > { %v1750_v49 = vrot.slane %v1749_v47, 1  ;;  %v1770_v50 = vadd.f32 %v1769_v48, %v1768_v46 }
 0x19b   : > { %v1771_v51 = vrot.slane %v1770_v50, 1  ;;  %v1751_v52 = vadd.f32 %v1750_v49, %v1749_v47 }
 0x19d   : > { %v1772_v53 = vadd.f32 %v1771_v51, %v1770_v50 }
 0x19f   : > { %v1774_v54 = vsel %vm1773_vm0, %v1751_v52, %v1772_v53 }
 0x1a0   : > { %v1776_v55 = vsel %vm1775_vm1, %v1774_v54, 0.0 }
 0x1a1   : > { %1777 = vst [vmem:[%s216_s24] sm:$0xff] %v1776_v55 }
 0x1a2 PF: > { %s15_s15 = sadd.s32 1, %s2457_s15  }
 0x1a3   : > { %p12_p5 = scmp.ge.s32.totalorder %s15_s15, 4  }
 0x1a5   :  { %14 = sbr.rel (!%p12_p5) target bundleno = 1 (0x1), region = 74 }

// kernel: basic_block_forward.5
= control target key start
LH: loop header
LB: loop body
LE: loop exit
PB: predicated region body
PF: predicated region fallthrough
CT: control target
= control target key end

     0   :  { %s2506_s15 = smov 0   ;;  %s3178_s0 = inlined_call_operand.vmem [shape: bf16[2,10,10,128], index: 0, kind: input, shape index: {}]   ;;  %s3179_s1 = inlined_call_operand.vmem [shape: bf16[1152,128], index: 1, kind: input, shape index: {}]   ;;  %s3180_s2 = inlined_call_operand.vmem [shape: f32[1,128], index: 2, kind: input, shape index: {}]   ;;  %s3181_s3 = inlined_call_operand.vmem [shape: bf16[2,8,8,128], index: 3, kind: input, shape index: {}]   ;;  %s3182_s4 = inlined_call_operand.vmem [shape: f32[2,8,8,128], index: 4, kind: output, shape index: {}]  }
   0x1 LB: > { %s1954_s16 = sadd.s32 4294967295, %s2479_s15   ;;  %p1958_p0 = scmp.ge.s32.totalorder %s2479_s15, 1  ;;  %s2479_s15 = sphi %s2506_s15, %s14_s15  }
   0x2   : > { %p172_p1 = scmp.lt.s32.totalorder %s2479_s15, 3 }
   0x4   : > { %p173_p2 = pnand %p1958_p0, %p172_p1 }
   0x5   : > { %v2389_v0 = vld [vmem:[%s3179_s1 + $0x40] sm:$0xff] (!%p173_p2)   ;;  %v2393_v4 = vld [vmem:[%s3179_s1 + $0x48] sm:$0xff] (!%p173_p2)   ;;  %v2397_v8 = vld [vmem:[%s3179_s1 + $0x50] sm:$0xff] (!%p173_p2)   ;;  %p203_p3 = scmp.lt.s32.totalorder (!%p173_p2), %s1954_s16, 1  ;;  %vm374_vm0 = vcmask (!%p173_p2), 1042432   ;;  %vm375_vm1 = vcmask (!%p173_p2), 1046532  }
   0x6   : > { %176 = sbr.rel (%p173_p2) target bundleno = 331 (0x14b), region = 36  ;;  %v2390_v1 = vld [vmem:[%s3179_s1 + $0xc0] sm:$0xff] (!%p173_p2)   ;;  %2168 = vmatprep.subr.bf16.mxu0 (!%p173_p2), %v2389_v0  ;;  %v2394_v5 = vld [vmem:[%s3179_s1 + $0xc8] sm:$0xff] (!%p173_p2)   ;;  %v2398_v9 = vld [vmem:[%s3179_s1 + $0xd0] sm:$0xff] (!%p173_p2)   ;;  %vm235_vm2 = vsmask.f32 (!%p173_p2), 3328 }
   0x7   : > { %v2391_v2 = vld [vmem:[%s3179_s1] sm:$0xff] (!%p173_p2)   ;;  %2208 = vmatprep.subr.bf16.mxu1 (!%p173_p2), %v2390_v1  ;;  %v2395_v6 = vld [vmem:[%s3179_s1 + $0x8] sm:$0xff] (!%p173_p2)   ;;  %v2399_v10 = vld [vmem:[%s3179_s1 + $0x10] sm:$0xff] (!%p173_p2)   ;;  %vm236_vm3 = vsmask.f32 (!%p173_p2), 7440 }
   0x8   : > { %v2392_v3 = vld [vmem:[%s3179_s1 + $0x80] sm:$0xff] (!%p173_p2)   ;;  %2169 = vmatpush3.bf16.msra.mxu0 (!%p173_p2), %v2391_v2  ;;  %v2396_v7 = vld [vmem:[%s3179_s1 + $0x88] sm:$0xff] (!%p173_p2)   ;;  %v2400_v11 = vld [vmem:[%s3179_s1 + $0x90] sm:$0xff] (!%p173_p2)  }
   0x9   : > { %2209 = vmatpush3.bf16.msra.mxu1 (!%p173_p2), %v2392_v3  ;;  %2170 = vmatprep.subr.bf16.mxu0 (!%p173_p2), %v2393_v4  ;;  %v2401_v12 = vld [vmem:[%s3179_s1 + $0x58] sm:$0xff] (!%p173_p2)   ;;  %v2405_v16 = vld [vmem:[%s3179_s1 + $0x60] sm:$0xff] (!%p173_p2)   ;;  %v2409_v20 = vld [vmem:[%s3179_s1 + $0x68] sm:$0xff] (!%p173_p2)  }
   0xa   : > { %2210 = vmatprep.subr.bf16.mxu1 (!%p173_p2), %v2394_v5  ;;  %v2402_v13 = vld [vmem:[%s3179_s1 + $0xd8] sm:$0xff] (!%p173_p2)   ;;  %v2406_v17 = vld [vmem:[%s3179_s1 + $0xe0] sm:$0xff] (!%p173_p2)   ;;  %v2410_v21 = vld [vmem:[%s3179_s1 + $0xe8] sm:$0xff] (!%p173_p2)  }
   0xb   : > { %v2403_v14 = vld [vmem:[%s3179_s1 + $0x18] sm:$0xff] (!%p173_p2)   ;;  %v2407_v18 = vld [vmem:[%s3179_s1 + $0x20] sm:$0xff] (!%p173_p2)   ;;  %v2411_v22 = vld [vmem:[%s3179_s1 + $0x28] sm:$0xff] (!%p173_p2)  }
   0xc   : > { %2171 = vmatpush3.bf16.msra.mxu0 (!%p173_p2), %v2395_v6  ;;  %v2404_v15 = vld [vmem:[%s3179_s1 + $0x98] sm:$0xff] (!%p173_p2)   ;;  %v2408_v19 = vld [vmem:[%s3179_s1 + $0xa0] sm:$0xff] (!%p173_p2)   ;;  %v2412_v23 = vld [vmem:[%s3179_s1 + $0xa8] sm:$0xff] (!%p173_p2)  }
   0xd   : > { %2211 = vmatpush3.bf16.msra.mxu1 %v2396_v7  ;;  %2172 = vmatprep.subr.bf16.mxu0 %v2397_v8  ;;  %s3188_s16 = smov (!%p203_p3, %s1954_s16), 1  ;;  %v2413_v24 = vld [vmem:[%s3179_s1 + $0x70] sm:$0xff]   ;;  %v2417_v28 = vld [vmem:[%s3179_s1 + $0x78] sm:$0xff]   ;;  %vm2635_vm4 = vmor %vm374_vm0, %vm375_vm1 }
   0xe   : > { %2212 = vmatprep.subr.bf16.mxu1 %v2398_v9  ;;  %v2414_v25 = vld [vmem:[%s3179_s1 + $0xf0] sm:$0xff]   ;;  %s2380_s21 = smul.u32 80, %s3188_s16  ;;  %v2418_v29 = vld [vmem:[%s3179_s1 + $0xf8] sm:$0xff]   ;;  %vm2641_vm5 = vmor %vm235_vm2, %vm236_vm3  ;;  %s2147_s25 = sshll.u32 %s3188_s16, 5 }
   0xf   : > { %v2415_v26 = vld [vmem:[%s3179_s1 + $0x30] sm:$0xff]   ;;  %v2419_v30 = vld [vmem:[%s3179_s1 + $0x38] sm:$0xff]   ;;  %v2423_v60 = vld [vmem:[%s3179_s1 + $0x140] sm:$0xff]   ;;  %s212_s28 = scalar_lea.vmem %s3181_s3, %s2147_s25  ;;  %s2148_s29 = sshll.u32 %s3188_s16, 6 }
  0x10   : > { %2173 = vmatpush3.bf16.msra.mxu0 %v2399_v10  ;;  %v2416_v27 = vld [vmem:[%s3179_s1 + $0xb0] sm:$0xff]   ;;  %s2614_s6 = scalar_lea.vmem %s3178_s0, %s2380_s21  ;;  %v2420_v31 = vld [vmem:[%s3179_s1 + $0xb8] sm:$0xff]   ;;  %v2424_v1 = vld [vmem:[%s3179_s1 + $0x1c0] sm:$0xff]   ;;  %s3163_s7 = scalar_lea.vmem %s3182_s4, %s2148_s29 }
  0x11   : > { %2213 = vmatpush3.bf16.msra.mxu1 %v2400_v11  ;;  %2174 = vmatprep.subr.bf16.mxu0 %v2401_v12  ;;  %v219_v32 = vld [vmem:[%s2614_s6] sm:$0xf]  ;;  %v220_v33 = vld [vmem:[%s2614_s6 + $0x8] sm:$0xf]  ;;  %v227_v34 = vld [vmem:[%s2614_s6 + $0x4] sm:$0x1] }
  0x12   : > { %2214 = vmatprep.subr.bf16.mxu1 %v2402_v13  ;;  %v228_v35 = vld [vmem:[%s2614_s6 + $0xc] sm:$0x1]  ;;  %v239_v36 = vshrl.u32 %v219_v32, 16  ;;  %v242_v37 = vshll.u32 %v219_v32, 16  ;;  %v248_v38 = vshll.u32 %v227_v34, 16  ;;  %v253_v39 = vshrl.u32 %v220_v33, 16 }
  0x13   : > { %v256_v40 = vshll.u32 %v220_v33, 16  ;;  %v262_v41 = vshll.u32 %v228_v35, 16  ;;  %v1972_v42 = vld [vmem:[%s2614_s6 + $0x8] sm:$0xf]  ;;  %v2628_v43 = vld [vmem:[%s2614_s6 + $0x10] sm:$0xf]  ;;  %v2036_v8 = vcombine.low %v219_v32, %v220_v33 }
  0x14   : > { %2175 = vmatpush3.bf16.msra.mxu0 %v2403_v14  ;;  %v241_v44 = vrot.slane %v239_v36, 4  ;;  %v244_v45 = vrot.slane %v242_v37, 5  ;;  %v255_v46 = vrot.slane %v253_v39, 4  ;;  %v350_v47 = vld [vmem:[%s2614_s6] sm:$0xe]  ;;  %v379_v49 = vrot.slane %v227_v34, 5 }
  0x15   : > { %2215 = vmatpush3.bf16.msra.mxu1 %v2404_v15  ;;  %2176 = vmatprep.subr.bf16.mxu0 %v2405_v16  ;;  %v258_v48 = vrot.slane %v256_v40, 5  ;;  %v351_v50 = vld [vmem:[%s2614_s6 + $0x8] sm:$0xe]  ;;  %v250_v52 = vrot.slane %v248_v38, 5  ;;  %v383_v53 = vrot.slane %v228_v35, 5  ;;  %v2048_v54 = vcombine.low %v1972_v42, %v2628_v43  ;;  %v2425_v5 = vld [vmem:[%s3179_s1 + $0x100] sm:$0xff]  }
  0x16   : > { %2216 = vmatprep.subr.bf16.mxu1 %v2406_v17  ;;  %v245_v51 = vor.u32 %v244_v45, %v241_v44  ;;  %v264_v58 = vrot.slane %v262_v41, 5  ;;  %v1964_v59 = vrot.slane %v350_v47, 9  ;;  %v1965_v62 = vrot.slane %v351_v50, 9  ;;  %v2426_v10 = vld [vmem:[%s3179_s1 + $0x180] sm:$0xff]   ;;  %v2427_v12 = vld [vmem:[%s3179_s1 + $0x148] sm:$0xff]  }
  0x17   : > { %v259_v57 = vor.u32 %v258_v48, %v255_v46  ;;  %1627 = vmatprep.mubr.bf16.mxu1 %v2048_v54  ;;  %v427_v3 = vshrl.u32 %v1972_v42, 16  ;;  %v430_v7 = vshll.u32 %v1972_v42, 16  ;;  %v441_v13 = vshrl.u32 %v2628_v43, 16  ;;  %v2428_v14 = vld [vmem:[%s3179_s1 + $0x1c8] sm:$0xff]   ;;  %v2692_v32 = vld [vmem:[%s2614_s6 + $0x20] sm:$0xf] }
  0x18   : > { %2177 = vmatpush3.bf16.msra.mxu0 %v2407_v18  ;;  %v246_v61 = vrot.slane %v245_v51, 4  ;;  %v380_v0 = vsel %vm2635_vm4, %v1964_v59, %v379_v49  ;;  %v384_v4 = vsel %vm2635_vm4, %v1965_v62, %v383_v53  ;;  %v2429_v16 = vld [vmem:[%s3179_s1 + $0x108] sm:$0xff]   ;;  %v444_v33 = vshll.u32 %v2628_v43, 16  ;;  %v352_v36 = vld [vmem:[%s2614_s6 + $0x10] sm:$0xe] }
  0x19   : > { %2217 = vmatpush3.bf16.msra.mxu1 %v2408_v19  ;;  %2178 = vmatprep.subr.bf16.mxu0 %v2409_v20  ;;  %v260_v63 = vrot.slane %v259_v57, 4  ;;  %v2044_v9 = vcombine.low %v380_v0, %v384_v4  ;;  %v429_v15 = vrot.slane %v427_v3, 4  ;;  %v432_v17 = vrot.slane %v430_v7, 5  ;;  %v2430_v18 = vld [vmem:[%s3179_s1 + $0x188] sm:$0xff]   ;;  %v2679_v19 = vld [vmem:[%s2614_s6 + $0x10] sm:$0xf] }
  0x1a   : > { %2218 = vmatprep.subr.bf16.mxu1 %v2410_v21  ;;  %v251_v2 = vsel %vm2641_vm5, %v246_v61, %v250_v52  ;;  %v2682_v20 = vld [vmem:[%s2614_s6 + $0x18] sm:$0xf]  ;;  %v229_v21 = vld [vmem:[%s2614_s6 + $0x14] sm:$0x1]  ;;  %v2696_v38 = vrot.slane %v441_v13, 4  ;;  %v1966_v47 = vrot.slane %v352_v36, 9 }
  0x1b   : > { %v265_v6 = vsel %vm2641_vm5, %v260_v63, %v264_v58  ;;  %v433_v37 = vor.u32 %v432_v17, %v429_v15  ;;  %v353_v41 = vld [vmem:[%s2614_s6 + $0x18] sm:$0xe]  ;;  %v2433_v42 = vld [vmem:[%s3179_s1 + $0x150] sm:$0xff]   ;;  %v387_v49 = vrot.slane %v229_v21, 5  ;;  %v446_v57 = vrot.slane %v444_v33, 5 }
  0x1c   : > { %2179 = vmatpush3.bf16.msra.mxu0 %v2411_v22  ;;  %v2040_v11 = vcombine.low %v251_v2, %v265_v6  ;;  %v230_v22 = vld [vmem:[%s2614_s6 + $0x1c] sm:$0x1]  ;;  %v1967_v50 = vrot.slane %v353_v41, 9  ;;  %v2434_v54 = vld [vmem:[%s3179_s1 + $0x1d0] sm:$0xff]   ;;  %v2037_v63 = vcombine.low %v2679_v19, %v2682_v20  ;;  %v2740_v13 = vld [vmem:[%s2614_s6 + $0x20] sm:$0xf] }
  0x1d   : > { %2219 = vmatpush3.bf16.msra.mxu1 %v2412_v23  ;;  %2180 = vmatprep.subr.bf16.mxu0 %v2413_v24  ;;  %v267_v23 = vshrl.u32 %v2679_v19, 16  ;;  %v270_v24 = vshll.u32 %v2679_v19, 16  ;;  %v391_v53 = vrot.slane %v230_v22, 5  ;;  %v388_v59 = vsel %vm2635_vm4, %v1966_v47, %v387_v49  ;;  %v2438_v7 = vld [vmem:[%s3179_s1 + $0x1d8] sm:$0xff]   ;;  %v231_v15 = vld [vmem:[%s2614_s6 + $0x24] sm:$0x1] }
  0x1e   : > { %2220 = vmatprep.subr.bf16.mxu1 %v2414_v25  ;;  %1562 = vmatprep.mubr.bf16.mxu0 %v2040_v11  ;;  %v276_v25 = vshll.u32 %v229_v21, 16  ;;  %v2713_v61 = vrot.slane %v433_v37, 4  ;;  %v472_v11 = vshll.u32 %v2692_v32, 16  ;;  %v295_v17 = vshrl.u32 %v2740_v13, 16  ;;  %v355_v37 = vld [vmem:[%s2614_s6 + $0x28] sm:$0xe] }
  0x1f   : > { %v392_v0 = vsel %vm2635_vm4, %v1967_v50, %v391_v53  ;;  %v304_v19 = vshll.u32 %v231_v15, 16  ;;  %v2443_v41 = vld [vmem:[%s3179_s1 + $0x160] sm:$0xff]   ;;  %v395_v47 = vrot.slane %v231_v15, 5 }
  0x20   : > { %2181 = vmatpush3.bf16.msra.mxu0 %v2415_v26  ;;  %v281_v26 = vshrl.u32 %v2682_v20, 16  ;;  %v278_v40 = vrot.slane %v276_v25, 5  ;;  %v2045_v4 = vcombine.low %v388_v59, %v392_v0  ;;  %v2444_v50 = vld [vmem:[%s3179_s1 + $0x1e0] sm:$0xff]  }
  0x21   : > { %2221 = vmatpush3.bf16.msra.mxu1 %v2416_v27  ;;  %2182 = vmatprep.subr.bf16.mxu0 %v2417_v28  ;;  %v284_v27 = vshll.u32 %v2682_v20, 16  ;;  %v290_v28 = vshll.u32 %v230_v22, 16  ;;  %v306_v33 = vrot.slane %v304_v19, 5 }
  0x22   : > { %2222 = vmatprep.subr.bf16.mxu1 %v2418_v29  ;;  %v269_v29 = vrot.slane %v267_v23, 4  ;;  %v283_v34 = vrot.slane %v281_v26, 4  ;;  %v1976_v23 = vld [vmem:[%s2614_s6 + $0x28] sm:$0xf] }
  0x23   : > { %v286_v35 = vrot.slane %v284_v27, 5  ;;  %v292_v45 = vrot.slane %v290_v28, 5  ;;  %v297_v27 = vrot.slane %v295_v17, 4 }
  0x24   : > { %2183 = vmatpush3.bf16.msra.mxu0 %v2419_v30  ;;  %v272_v30 = vrot.slane %v270_v24, 5  ;;  %v1977_v24 = vld [vmem:[%s2614_s6 + $0x30] sm:$0xf] }
  0x25   : > { %2223 = vmatpush3.bf16.msra.mxu1 %v2420_v31  ;;  %2248 = vmatprep.subr.bf16.mxu0 %v2423_v60  ;;  %v1974_v31 = vld [vmem:[%s2614_s6 + $0x18] sm:$0xf]  ;;  %v287_v44 = vor.u32 %v286_v35, %v283_v34  ;;  %v2435_v60 = vld [vmem:[%s3179_s1 + $0x110] sm:$0xff]   ;;  %v2050_v36 = vcombine.low %v1976_v23, %v1977_v24 }
  0x26   : > { %2288 = vmatprep.subr.bf16.mxu1 %v2424_v1  ;;  %v273_v39 = vor.u32 %v272_v30, %v269_v29  ;;  %v2049_v46 = vcombine.low %v1974_v31, %v2692_v32  ;;  %v455_v48 = vshrl.u32 %v1974_v31, 16  ;;  %v458_v52 = vshll.u32 %v1974_v31, 16  ;;  %v2436_v1 = vld [vmem:[%s3179_s1 + $0x190] sm:$0xff]   ;;  %v354_v30 = vld [vmem:[%s2614_s6 + $0x20] sm:$0xe] }
  0x27   : > { %1563 = vmatmul.mubr.bf16.vlgmr.msra.gmra.mrb[0].mxu0 %v2036_v8  ;;  %v288_v51 = vrot.slane %v287_v44, 4  ;;  %v469_v8 = vshrl.u32 %v2692_v32, 16  ;;  %v2758_v32 = vrot.slane %v472_v11, 5  ;;  %v233_v11 = vld [vmem:[%s2614_s6 + $0x34] sm:$0x1] }
  0x28   : > { %1628 = vmatmul.mubr.bf16.vlgmr.msra.gmra.mrb[0].mxu1 %v2044_v9  ;;  %2249 = vmatpush3.bf16.msra.mxu0 %v2425_v5  ;;  %v274_v43 = vrot.slane %v273_v39, 4  ;;  %v457_v3 = vrot.slane %v455_v48, 4  ;;  %v2437_v5 = vld [vmem:[%s3179_s1 + $0x158] sm:$0xff]   ;;  %v460_v6 = vrot.slane %v458_v52, 5  ;;  %v1969_v48 = vrot.slane %v355_v37, 9 }
  0x29   : > { %2289 = vmatpush3.bf16.msra.mxu1 %v2426_v10  ;;  %2250 = vmatprep.subr.bf16.mxu0 %v2427_v12  ;;  %v293_v62 = vsel %vm2641_vm5, %v288_v51, %v292_v45  ;;  %v2439_v9 = vld [vmem:[%s3179_s1 + $0x118] sm:$0xff]   ;;  %v447_v10 = vor.u32 %v446_v57, %v2696_v38  ;;  %v2756_v31 = vrot.slane %v469_v8, 4  ;;  %v483_v45 = vshrl.u32 %v1976_v23, 16  ;;  %v2450_v8 = vld [vmem:[%s3179_s1 + $0x1a8] sm:$0xff]  }
  0x2a   : > { %2290 = vmatprep.subr.bf16.mxu1 %v2428_v14  ;;  %1635 = vmatprep.mubr.bf16.mxu1 %v2049_v46  ;;  %v279_v58 = vsel %vm2641_vm5, %v274_v43, %v278_v40  ;;  %v2440_v12 = vld [vmem:[%s3179_s1 + $0x198] sm:$0xff]   ;;  %v2743_v14 = vld [vmem:[%s2614_s6 + $0x28] sm:$0xf]  ;;  %v461_v25 = vor.u32 %v460_v6, %v457_v3  ;;  %v1968_v40 = vrot.slane %v354_v30, 9  ;;  %v486_v46 = vshll.u32 %v1976_v23, 16 }
  0x2b   : > { %v2041_v2 = vcombine.low %v279_v58, %v293_v62  ;;  %v309_v20 = vshrl.u32 %v2743_v14, 16  ;;  %v312_v21 = vshll.u32 %v2743_v14, 16  ;;  %v2753_v26 = vrot.slane %v447_v10, 4  ;;  %v2446_v62 = vld [vmem:[%s3179_s1 + $0x1a0] sm:$0xff]   ;;  %v2449_v6 = vld [vmem:[%s3179_s1 + $0x128] sm:$0xff]  }
  0x2c   : > { %2251 = vmatpush3.bf16.msra.mxu0 %v2429_v16  ;;  %v232_v16 = vld [vmem:[%s2614_s6 + $0x2c] sm:$0x1]  ;;  %v497_v52 = vshrl.u32 %v1977_v24, 16  ;;  %v396_v53 = vsel %vm2635_vm4, %v1968_v40, %v395_v47  ;;  %v500_v58 = vshll.u32 %v1977_v24, 16  ;;  %v2038_v59 = vcombine.low %v2740_v13, %v2743_v14  ;;  %v2805_v10 = vld [vmem:[%s2614_s6 + $0x38] sm:$0xf] }
  0x2d   : > { %2291 = vmatpush3.bf16.msra.mxu1 %v2430_v18  ;;  %2252 = vmatprep.subr.bf16.mxu0 %v2433_v42  ;;  %v298_v18 = vshll.u32 %v2740_v13, 16  ;;  %v318_v22 = vshll.u32 %v232_v16, 16  ;;  %v311_v29 = vrot.slane %v309_v20, 4  ;;  %v314_v34 = vrot.slane %v312_v21, 5  ;;  %v1979_v21 = vld [vmem:[%s2614_s6 + $0x40] sm:$0xf] }
  0x2e   : > { %2292 = vmatprep.subr.bf16.mxu1 %v2434_v54  ;;  %1570 = vmatprep.mubr.bf16.mxu0 %v2041_v2  ;;  %v2764_v42 = vrot.slane %v461_v25, 4  ;;  %v399_v49 = vrot.slane %v232_v16, 5  ;;  %v2445_v54 = vld [vmem:[%s3179_s1 + $0x120] sm:$0xff]   ;;  %v485_v0 = vrot.slane %v483_v45, 4  ;;  %v2447_v2 = vld [vmem:[%s3179_s1 + $0x168] sm:$0xff]   ;;  %v488_v3 = vrot.slane %v486_v46, 5 }
  0x2f   : > { %1571 = vmatmul.mubr.bf16.gmra.mrb[4].mxu0 %v2037_v63  ;;  %v300_v28 = vrot.slane %v298_v18, 5  ;;  %v315_v38 = vor.u32 %v314_v34, %v311_v29  ;;  %v320_v39 = vrot.slane %v318_v22, 5  ;;  %v475_v13 = vor.u32 %v2758_v32, %v2756_v31  ;;  %v1978_v18 = vld [vmem:[%s2614_s6 + $0x38] sm:$0xf]  ;;  %v2454_v45 = vld [vmem:[%s3179_s1 + $0x1f0] sm:$0xff]  }
  0x30   : > { %2253 = vmatpush3.bf16.msra.mxu0 %v2435_v60  ;;  %1636 = vmatmul.mubr.bf16.gmra.mrb[4].mxu1 %v2045_v4  ;;  %v400_v60 = vsel %vm2635_vm4, %v1969_v48, %v399_v49  ;;  %v2448_v4 = vld [vmem:[%s3179_s1 + $0x1e8] sm:$0xff]   ;;  %v332_v16 = vshll.u32 %v233_v11, 16  ;;  %v337_v17 = vshrl.u32 %v2805_v10, 16  ;;  %v340_v19 = vshll.u32 %v2805_v10, 16 }
  0x31   : > { %2293 = vmatpush3.bf16.msra.mxu1 %v2436_v1  ;;  %2254 = vmatprep.subr.bf16.mxu0 %v2437_v5  ;;  %v301_v35 = vor.u32 %v300_v28, %v297_v27  ;;  %v316_v43 = vrot.slane %v315_v38, 4  ;;  %v2046_v1 = vcombine.low %v396_v53, %v400_v60  ;;  %v2791_v5 = vrot.slane %v497_v52, 4  ;;  %v356_v28 = vld [vmem:[%s2614_s6 + $0x30] sm:$0xe] }
  0x32   : > { %2294 = vmatprep.subr.bf16.mxu1 %v2438_v7  ;;  %1643 = vmatprep.mubr.bf16.mxu1 %v2050_v36  ;;  %v2796_v7 = vrot.slane %v500_v58, 5  ;;  %v511_v22 = vshrl.u32 %v1978_v18, 16  ;;  %v514_v23 = vshll.u32 %v1978_v18, 16  ;;  %v339_v27 = vrot.slane %v337_v17, 4 }
  0x33   : > { %v302_v44 = vrot.slane %v301_v35, 4  ;;  %v321_v57 = vsel %vm2641_vm5, %v316_v43, %v320_v39  ;;  %v489_v29 = vor.u32 %v488_v3, %v485_v0  ;;  %v334_v30 = vrot.slane %v332_v16, 5 }
  0x34   : > { %2255 = vmatpush3.bf16.msra.mxu0 %v2439_v9  ;;  %v2802_v9 = vld [vmem:[%s2614_s6 + $0x30] sm:$0xf]  ;;  %v342_v31 = vrot.slane %v340_v19, 5  ;;  %v2819_v34 = vrot.slane %v475_v13, 4  ;;  %v513_v36 = vrot.slane %v511_v22, 4  ;;  %v516_v37 = vrot.slane %v514_v23, 5 }
  0x35   : > { %2295 = vmatpush3.bf16.msra.mxu1 %v2440_v12  ;;  %2256 = vmatprep.subr.bf16.mxu0 %v2443_v41  ;;  %v307_v51 = vsel %vm2641_vm5, %v302_v44, %v306_v33  ;;  %v234_v12 = vld [vmem:[%s2614_s6 + $0x3c] sm:$0x1]  ;;  %v323_v14 = vshrl.u32 %v2802_v9, 16  ;;  %v326_v15 = vshll.u32 %v2802_v9, 16  ;;  %v357_v33 = vld [vmem:[%s2614_s6 + $0x38] sm:$0xe]  ;;  %v2051_v38 = vcombine.low %v1978_v18, %v1979_v21 }
  0x36   : > { %2296 = vmatprep.subr.bf16.mxu1 %v2444_v50  ;;  %v2042_v63 = vcombine.low %v307_v51, %v321_v57  ;;  %v346_v20 = vshll.u32 %v234_v12, 16  ;;  %v343_v39 = vor.u32 %v342_v31, %v339_v27  ;;  %v1970_v40 = vrot.slane %v356_v28, 9  ;;  %v2453_v44 = vld [vmem:[%s3179_s1 + $0x170] sm:$0xff]   ;;  %v2871_v23 = vld [vmem:[%s2614_s6 + $0x18] sm:$0xf] }
  0x37   : > { %v325_v24 = vrot.slane %v323_v14, 4  ;;  %v328_v25 = vrot.slane %v326_v15, 5  ;;  %v403_v41 = vrot.slane %v233_v11, 5  ;;  %v503_v46 = vor.u32 %v2796_v7, %v2791_v5  ;;  %v2455_v57 = vld [vmem:[%s3179_s1 + $0x130] sm:$0xff]   ;;  %v2458_v5 = vld [vmem:[%s3179_s1 + $0x1f8] sm:$0xff]  }
  0x38   : > { %2257 = vmatpush3.bf16.msra.mxu0 %v2445_v54  ;;  %1578 = vmatprep.mubr.bf16.mxu0 %v2042_v63  ;;  %v348_v32 = vrot.slane %v346_v20, 5  ;;  %v525_v43 = vshrl.u32 %v1979_v21, 16  ;;  %v1971_v48 = vrot.slane %v357_v33, 9  ;;  %v2829_v49 = vrot.slane %v489_v29, 4  ;;  %v2459_v7 = vld [vmem:[%s3179_s1 + $0x138] sm:$0xff]  }
  0x39   : > { %2297 = vmatpush3.bf16.msra.mxu1 %v2446_v62  ;;  %1579 = vmatmul.mubr.bf16.gmra.mrb[8].mxu0 %v2038_v59  ;;  %v329_v35 = vor.u32 %v328_v25, %v325_v24  ;;  %v344_v50 = vrot.slane %v343_v39, 4  ;;  %v404_v51 = vsel %vm2635_vm4, %v1970_v40, %v403_v41  ;;  %v407_v52 = vrot.slane %v234_v12, 5  ;;  %v2456_v62 = vld [vmem:[%s3179_s1 + $0x1b0] sm:$0xff]   ;;  %v1988_v14 = vld [vmem:[%s2614_s6 + $0x8] sm:$0xe] }
  0x3a   : > { %1644 = vmatmul.mubr.bf16.gmra.mrb[8].mxu1 %v2046_v1  ;;  %2258 = vmatprep.subr.bf16.mxu0 %v2447_v2  ;;  %v528_v54 = vshll.u32 %v1979_v21, 16  ;;  %v2039_v59 = vcombine.low %v2802_v9, %v2805_v10  ;;  %v517_v63 = vor.u32 %v516_v37, %v513_v36  ;;  %v2457_v2 = vld [vmem:[%s3179_s1 + $0x178] sm:$0xff]   ;;  %v2850_v3 = vrot.slane %v503_v46, 4  ;;  %v1980_v9 = vld [vmem:[%s2614_s6 + $0xc] sm:$0x1]  ;;  %v2891_v37 = vld [vmem:[%s3179_s1 + $0x200] sm:$0xff]  }
  0x3b   : > { %2298 = vmatprep.subr.bf16.mxu1 %v2448_v4  ;;  %v330_v47 = vrot.slane %v329_v35, 4  ;;  %1651 = vmatprep.mubr.bf16.mxu1 %v2051_v38  ;;  %v349_v58 = vsel %vm2641_vm5, %v344_v50, %v348_v32  ;;  %v408_v60 = vsel %vm2635_vm4, %v1971_v48, %v407_v52  ;;  %v527_v4 = vrot.slane %v525_v43, 4  ;;  %v1981_v10 = vld [vmem:[%s2614_s6 + $0x14] sm:$0x1]  ;;  %v1989_v15 = vld [vmem:[%s2614_s6 + $0x10] sm:$0xe] }
  0x3c   : > { %2259 = vmatpush3.bf16.msra.mxu0 %v2449_v6  ;;  %v2047_v1 = vcombine.low %v404_v51, %v408_v60  ;;  %v530_v6 = vrot.slane %v528_v54, 5  ;;  %v2863_v11 = vrot.slane %v517_v63, 4  ;;  %v436_v12 = vshll.u32 %v1980_v9, 16  ;;  %v2868_v20 = vld [vmem:[%s2614_s6 + $0x10] sm:$0xf] }
  0x3d   : > { %2299 = vmatpush3.bf16.msra.mxu1 %v2450_v8  ;;  %2260 = vmatprep.subr.bf16.mxu0 %v2453_v44  ;;  %v335_v53 = vsel %vm2641_vm5, %v330_v47, %v334_v30  ;;  %v2460_v8 = vld [vmem:[%s3179_s1 + $0x1b8] sm:$0xff]   ;;  %v450_v13 = vshll.u32 %v1981_v10, 16  ;;  %v1996_v16 = vrot.slane %v1988_v14, 9  ;;  %v564_v17 = vrot.slane %v1980_v9, 5  ;;  %v2874_v24 = vld [vmem:[%s2614_s6 + $0x14] sm:$0x1] }
  0x3e   : > { %2300 = vmatprep.subr.bf16.mxu1 %v2454_v45  ;;  %v2043_v0 = vcombine.low %v335_v53, %v349_v58  ;;  %v1997_v18 = vrot.slane %v1989_v15, 9  ;;  %v568_v19 = vrot.slane %v1981_v10, 5  ;;  %v438_v21 = vrot.slane %v436_v12, 5  ;;  %v2881_v29 = vld [vmem:[%s2614_s6 + $0x1c] sm:$0x1]  ;;  %v2904_v47 = vld [vmem:[%s3179_s1 + $0x208] sm:$0xff]  }
  0x3f   : > { %v452_v22 = vrot.slane %v450_v13, 5  ;;  %v531_v25 = vor.u32 %v530_v6, %v527_v4  ;;  %v565_v27 = vsel %vm2635_vm4, %v1996_v16, %v564_v17  ;;  %v612_v30 = vshrl.u32 %v2868_v20, 16  ;;  %v1982_v52 = vld [vmem:[%s2614_s6 + $0x1c] sm:$0x1]  ;;  %v1983_v53 = vld [vmem:[%s2614_s6 + $0x24] sm:$0x1] }
  0x40   : > { %2261 = vmatpush3.bf16.msra.mxu0 %v2455_v57  ;;  %1586 = vmatprep.mubr.bf16.mxu0 %v2043_v0  ;;  %v569_v28 = vsel %vm2635_vm4, %v1997_v18, %v568_v19  ;;  %v615_v31 = vshll.u32 %v2868_v20, 16  ;;  %v621_v33 = vshll.u32 %v2874_v24, 16  ;;  %v626_v35 = vshrl.u32 %v2871_v23, 16  ;;  %v1990_v54 = vld [vmem:[%s2614_s6 + $0x18] sm:$0xe]  ;;  %v2940_v14 = vld [vmem:[%s3179_s1 + $0x210] sm:$0xff]  }
  0x41   : > { %2301 = vmatpush3.bf16.msra.mxu1 %v2456_v62  ;;  %1587 = vmatmul.mubr.bf16.gmra.mrb[12].mxu0 %v2039_v59  ;;  %v2056_v32 = vcombine.low %v565_v27, %v569_v28  ;;  %v629_v36 = vshll.u32 %v2871_v23, 16  ;;  %v614_v38 = vrot.slane %v612_v30, 4  ;;  %v635_v40 = vshll.u32 %v2881_v29, 16  ;;  %v1991_v57 = vld [vmem:[%s2614_s6 + $0x20] sm:$0xe] }
  0x42   : > { %1652 = vmatmul.mubr.bf16.gmra.mrb[12].mxu1 %v2047_v1  ;;  %2262 = vmatprep.subr.bf16.mxu0 %v2457_v2  ;;  %v617_v39 = vrot.slane %v615_v31, 5  ;;  %v439_v41 = vsel %vm2641_vm5, %v2713_v61, %v438_v21  ;;  %v628_v44 = vrot.slane %v626_v35, 4  ;;  %v453_v46 = vsel %vm2641_vm5, %v2753_v26, %v452_v22  ;;  %v2914_v0 = vld [vmem:[%s2614_s6 + $0x20] sm:$0xf]  ;;  %v2923_v6 = vld [vmem:[%s2614_s6 + $0x24] sm:$0x1] }
  0x43   : > { %2302 = vmatprep.subr.bf16.mxu1 %v2458_v5  ;;  %1692 = vmatprep.mubr.bf16.mxu0 %v2056_v32  ;;  %v631_v45 = vrot.slane %v629_v36, 5  ;;  %v2906_v43 = vrot.slane %v531_v25, 4  ;;  %v623_v61 = vrot.slane %v621_v33, 5  ;;  %v637_v50 = vrot.slane %v635_v40, 5  ;;  %v2920_v5 = vld [vmem:[%s2614_s6 + $0x28] sm:$0xf] }
  0x44   : > { %2263 = vmatpush3.bf16.msra.mxu0 %v2459_v7  ;;  %v618_v48 = vor.u32 %v617_v39, %v614_v38  ;;  %v2052_v51 = vcombine.low %v439_v41, %v453_v46  ;;  %v572_v58 = vrot.slane %v1982_v52, 5  ;;  %v576_v59 = vrot.slane %v1983_v53, 5  ;;  %v2934_v12 = vld [vmem:[%s2614_s6 + $0x2c] sm:$0x1]  ;;  %v2958_v36 = vld [vmem:[%s3179_s1 + $0x218] sm:$0xff]  }
  0x45   : > { %2303 = vmatpush3.bf16.msra.mxu1 %v2460_v8  ;;  %2340 = vmatprep.subr.bf16.mxu0 %v2891_v37  ;;  %v632_v26 = vor.u32 %v631_v45, %v628_v44  ;;  %v1998_v62 = vrot.slane %v1990_v54, 9  ;;  %v1999_v63 = vrot.slane %v1991_v57, 9  ;;  %v464_v1 = vshll.u32 %v1982_v52, 16  ;;  %v2952_v30 = vld [vmem:[%s2614_s6 + $0x2c] sm:$0x1] }
  0x46   : > { %2364 = vmatprep.subr.bf16.mxu1 %v2891_v37  ;;  %v619_v60 = vrot.slane %v618_v48, 4  ;;  %v2060_v4 = vcombine.low %v2868_v20, %v2871_v23  ;;  %v640_v7 = vshrl.u32 %v2914_v0, 16  ;;  %v643_v13 = vshll.u32 %v2914_v0, 16  ;;  %v2961_v38 = vld [vmem:[%s2614_s6 + $0x34] sm:$0x1] }
  0x47   : > { %v633_v2 = vrot.slane %v632_v26, 4  ;;  %v573_v9 = vsel %vm2635_vm4, %v1998_v62, %v572_v58  ;;  %v577_v10 = vsel %vm2635_vm4, %v1999_v63, %v576_v59  ;;  %v649_v18 = vshll.u32 %v2923_v6, 16  ;;  %v1992_v44 = vld [vmem:[%s2614_s6 + $0x28] sm:$0xe]  ;;  %v1993_v45 = vld [vmem:[%s2614_s6 + $0x30] sm:$0xe] }
  0x48   : > { %v624_v8 = vsel %vm2641_vm5, %v619_v60, %v623_v61  ;;  %v2057_v16 = vcombine.low %v573_v9, %v577_v10  ;;  %v642_v17 = vrot.slane %v640_v7, 4  ;;  %v645_v20 = vrot.slane %v643_v13, 5  ;;  %v2975_v52 = vld [vmem:[%s2614_s6 + $0x38] sm:$0xf]  ;;  %v2982_v57 = vld [vmem:[%s2614_s6 + $0x34] sm:$0x1] }
  0x49   : > { %1693 = vmatmul.mubr.bf16.vlgmr.msra.gmra.mrb[16].mxu0 %v2052_v51  ;;  %v638_v15 = vsel %vm2641_vm5, %v633_v2, %v637_v50  ;;  %v654_v21 = vshrl.u32 %v2920_v5, 16  ;;  %v657_v22 = vshll.u32 %v2920_v5, 16  ;;  %v651_v23 = vrot.slane %v649_v18, 5  ;;  %v2972_v51 = vld [vmem:[%s2614_s6 + $0x30] sm:$0xf]  ;;  %v2995_v63 = vld [vmem:[%s3179_s1 + $0x220] sm:$0xff]  }
  0x4a   : > { %2341 = vmatpush3.bf16.msra.mxu0 %v2891_v37  ;;  %v2064_v19 = vcombine.low %v624_v8, %v638_v15  ;;  %1700 = vmatprep.mubr.bf16.mxu0 %v2057_v16  ;;  %v663_v25 = vshll.u32 %v2934_v12, 16  ;;  %v757_v27 = vrot.slane %v2923_v6, 5  ;;  %v761_v28 = vrot.slane %v2934_v12, 5  ;;  %v2988_v59 = vld [vmem:[%s2614_s6 + $0x3c] sm:$0x1] }
  0x4b   : > { %2342 = vmatprep.subr.bf16.mxu0 %v2904_v47  ;;  %v646_v31 = vor.u32 %v645_v20, %v642_v17  ;;  %v656_v32 = vrot.slane %v654_v21, 4  ;;  %v659_v33 = vrot.slane %v657_v22, 5  ;;  %v466_v35 = vrot.slane %v464_v1, 5  ;;  %v3019_v16 = vld [vmem:[%s2614_s6 + $0x3c] sm:$0x1] }
  0x4c   : > { %1757 = vmatprep.mubr.bf16.mxu1 %v2064_v19  ;;  %v665_v39 = vrot.slane %v663_v25, 5  ;;  %v478_v40 = vshll.u32 %v1983_v53, 16  ;;  %v2061_v41 = vcombine.low %v2914_v0, %v2920_v5  ;;  %v2000_v50 = vrot.slane %v1992_v44, 9  ;;  %v3027_v21 = vld [vmem:[%s2614_s6 + $0x44] sm:$0x1] }
  0x4d   : > { %1758 = vmatmul.mubr.bf16.vlgmr.msra.gmra.mrb[16].mxu1 %v2060_v4  ;;  %v647_v46 = vrot.slane %v646_v31, 4  ;;  %v660_v48 = vor.u32 %v659_v33, %v656_v32  ;;  %v467_v61 = vsel %vm2641_vm5, %v2764_v42, %v466_v35  ;;  %v580_v26 = vrot.slane %v2952_v30, 5  ;;  %v1994_v31 = vld [vmem:[%s2614_s6 + $0x38] sm:$0xe]  ;;  %v1995_v32 = vld [vmem:[%s2614_s6 + $0x40] sm:$0xe] }
  0x4e   : > { %2343 = vmatpush3.bf16.msra.mxu0 %v2904_v47  ;;  %2372 = vmatpush3.bf16.msra.mxu1 %v2891_v37  ;;  %v480_v53 = vrot.slane %v478_v40, 5  ;;  %v2001_v37 = vrot.slane %v1993_v45, 9  ;;  %v584_v54 = vrot.slane %v2961_v38, 5  ;;  %v668_v60 = vshrl.u32 %v2972_v51, 16  ;;  %v3035_v40 = vld [vmem:[%s2614_s6 + $0x40] sm:$0xf] }
  0x4f   : > { %2344 = vmatprep.subr.bf16.mxu0 %v2940_v14  ;;  %2365 = vmatprep.subr.bf16.mxu1 %v2904_v47  ;;  %v652_v42 = vsel %vm2641_vm5, %v647_v46, %v651_v23  ;;  %v661_v58 = vrot.slane %v660_v48, 4  ;;  %v671_v62 = vshll.u32 %v2972_v51, 16  ;;  %v581_v1 = vsel %vm2635_vm4, %v2000_v50, %v580_v26  ;;  %v3055_v26 = vld [vmem:[%s2614_s6 + $0x4c] sm:$0x1] }
  0x50   : > { %v481_v0 = vsel %vm2641_vm5, %v2819_v34, %v480_v53  ;;  %v585_v2 = vsel %vm2635_vm4, %v2001_v37, %v584_v54  ;;  %v677_v4 = vshll.u32 %v2982_v57, 16  ;;  %v670_v9 = vrot.slane %v668_v60, 4  ;;  %v3052_v53 = vld [vmem:[%s2614_s6 + $0x44] sm:$0x1]  ;;  %v3061_v54 = vld [vmem:[%s3179_s1 + $0x230] sm:$0xff]  }
  0x51   : > { %v666_v5 = vsel %vm2641_vm5, %v661_v58, %v665_v39  ;;  %v2053_v7 = vcombine.low %v467_v61, %v481_v0  ;;  %v2058_v8 = vcombine.low %v581_v1, %v585_v2  ;;  %v673_v34 = vrot.slane %v671_v62, 5  ;;  %v3041_v61 = vld [vmem:[%s2614_s6 + $0x48] sm:$0xf] }
  0x52   : > { %2345 = vmatpush3.bf16.msra.mxu0 %v2940_v14  ;;  %2373 = vmatpush3.bf16.msra.mxu1 %v2904_v47  ;;  %v2065_v10 = vcombine.low %v652_v42, %v666_v5  ;;  %v3010_v13 = vrot.slane %v677_v4, 5  ;;  %v682_v15 = vshrl.u32 %v2975_v52, 16  ;;  %v3016_v47 = vld [vmem:[%s3179_s1 + $0x228] sm:$0xff]   ;;  %v685_v17 = vshll.u32 %v2975_v52, 16 }
  0x53   : > { %2346 = vmatprep.subr.bf16.mxu0 %v2958_v36  ;;  %2366 = vmatprep.subr.bf16.mxu1 %v2940_v14  ;;  %v691_v18 = vshll.u32 %v2988_v59, 16  ;;  %v492_v19 = vshll.u32 %v2952_v30, 16  ;;  %v506_v20 = vshll.u32 %v2961_v38, 16  ;;  %v674_v22 = vor.u32 %v673_v34, %v670_v9  ;;  %v2020_v34 = vld [vmem:[%s2614_s6 + $0x10] sm:$0xe] }
  0x54   : > { %1701 = vmatmul.mubr.bf16.gmra.mrb[20].mxu0 %v2053_v7  ;;  %1765 = vmatprep.mubr.bf16.mxu1 %v2065_v10  ;;  %v684_v23 = vrot.slane %v682_v15, 4  ;;  %v2062_v25 = vcombine.low %v2972_v51, %v2975_v52  ;;  %v588_v33 = vrot.slane %v3019_v16, 5  ;;  %v687_v30 = vrot.slane %v685_v17, 5  ;;  %v2023_v51 = vld [vmem:[%s2614_s6 + $0x28] sm:$0xe] }
  0x55   : > { %1708 = vmatprep.mubr.bf16.mxu0 %v2058_v8  ;;  %1766 = vmatmul.mubr.bf16.gmra.mrb[20].mxu1 %v2061_v41  ;;  %v693_v35 = vrot.slane %v691_v18, 5  ;;  %v494_v38 = vrot.slane %v492_v19, 5  ;;  %v508_v39 = vrot.slane %v506_v20, 5  ;;  %v675_v44 = vrot.slane %v674_v22, 4  ;;  %v2021_v19 = vld [vmem:[%s2614_s6 + $0x18] sm:$0xe] }
  0x56   : > { %2347 = vmatpush3.bf16.msra.mxu0 %v2958_v36  ;;  %2374 = vmatpush3.bf16.msra.mxu1 %v2940_v14  ;;  %v2002_v45 = vrot.slane %v1994_v31, 9  ;;  %v2003_v46 = vrot.slane %v1995_v32, 9  ;;  %v592_v48 = vrot.slane %v3027_v21, 5  ;;  %v688_v41 = vor.u32 %v687_v30, %v684_v23  ;;  %v2472_v32 = vld [vmem:[%s3179_s1 + $0x238] sm:$0xff]  }
  0x57   : > { %2348 = vmatprep.subr.bf16.mxu0 %v2995_v63  ;;  %2367 = vmatprep.subr.bf16.mxu1 %v2958_v36  ;;  %v495_v50 = vsel %vm2641_vm5, %v2829_v49, %v494_v38  ;;  %v509_v14 = vsel %vm2641_vm5, %v2850_v3, %v508_v39  ;;  %v696_v37 = vshrl.u32 %v3035_v40, 16  ;;  %v680_v49 = vsel %vm2641_vm5, %v675_v44, %v3010_v13 }
  0x58   : > { %v2054_v42 = vcombine.low %v495_v50, %v509_v14  ;;  %v589_v3 = vsel %vm2635_vm4, %v2002_v45, %v588_v33  ;;  %v593_v58 = vsel %vm2635_vm4, %v2003_v46, %v592_v48  ;;  %v689_v60 = vrot.slane %v688_v41, 4  ;;  %v2024_v33 = vld [vmem:[%s2614_s6 + $0x30] sm:$0xe]  ;;  %v2022_v46 = vld [vmem:[%s2614_s6 + $0x20] sm:$0xe] }
  0x59   : > { %v2059_v62 = vcombine.low %v589_v3, %v593_v58  ;;  %v698_v0 = vrot.slane %v696_v37, 4  ;;  %v699_v1 = vshll.u32 %v3035_v40, 16  ;;  %v705_v2 = vshll.u32 %v3052_v53, 16  ;;  %v2026_v14 = vld [vmem:[%s2614_s6 + $0x40] sm:$0xe] }
  0x5a   : > { %2349 = vmatpush3.bf16.msra.mxu0 %v2995_v63  ;;  %2375 = vmatpush3.bf16.msra.mxu1 %v2958_v36  ;;  %v710_v4 = vshrl.u32 %v3041_v61, 16  ;;  %v713_v5 = vshll.u32 %v3041_v61, 16  ;;  %v719_v7 = vshll.u32 %v3055_v26, 16  ;;  %v694_v8 = vsel %vm2641_vm5, %v689_v60, %v693_v35  ;;  %v2027_v37 = vld [vmem:[%s2614_s6 + $0x48] sm:$0xe] }
  0x5b   : > { %2350 = vmatprep.subr.bf16.mxu0 %v3016_v47  ;;  %2368 = vmatprep.subr.bf16.mxu1 %v2995_v63  ;;  %v701_v9 = vrot.slane %v699_v1, 5  ;;  %v773_v36 = vrot.slane %v3052_v53, 5  ;;  %v777_v10 = vrot.slane %v3055_v26, 5  ;;  %v2066_v13 = vcombine.low %v680_v49, %v694_v8  ;;  %v2072_v53 = vld [vmem:[%s3180_s2] ss:$0 sm:$0xff] }
  0x5c   : > { %1709 = vmatmul.mubr.bf16.gmra.mrb[24].mxu0 %v2054_v42  ;;  %v707_v15 = vrot.slane %v705_v2, 5  ;;  %v712_v17 = vrot.slane %v710_v4, 4  ;;  %v715_v18 = vrot.slane %v713_v5, 5  ;;  %v721_v22 = vrot.slane %v719_v7, 5 }
  0x5d   : > { %1716 = vmatprep.mubr.bf16.mxu0 %v2059_v62  ;;  %v702_v20 = vor.u32 %v701_v9, %v698_v0  ;;  %v520_v23 = vshll.u32 %v3019_v16, 16  ;;  %v534_v31 = vshll.u32 %v3027_v21, 16  ;;  %1773 = vmatprep.mubr.bf16.mxu1 %v2066_v13  ;;  %v2063_v35 = vcombine.low %v3035_v40, %v3041_v61  ;;  %v2025_v16 = vld [vmem:[%s2614_s6 + $0x38] sm:$0xe] }
  0x5e   : > { %2351 = vmatpush3.bf16.msra.mxu0 %v3016_v47  ;;  %2376 = vmatpush3.bf16.msra.mxu1 %v2995_v63  ;;  %v716_v30 = vor.u32 %v715_v18, %v712_v17  ;;  %v2028_v38 = vrot.slane %v2020_v34, 9  ;;  %v749_v39 = vrot.slane %v2874_v24, 5  ;;  %v2029_v45 = vrot.slane %v2021_v19, 9 }
  0x5f   : > { %2352 = vmatprep.subr.bf16.mxu0 %v3061_v54  ;;  %1774 = vmatmul.mubr.bf16.gmra.mrb[24].mxu1 %v2062_v25  ;;  %v703_v21 = vrot.slane %v702_v20, 4  ;;  %v522_v44 = vrot.slane %v520_v23, 5  ;;  %v536_v63 = vrot.slane %v534_v31, 5  ;;  %v753_v40 = vrot.slane %v2881_v29, 5 }
  0x60   : > { %2369 = vmatprep.subr.bf16.mxu1 %v3016_v47  ;;  %v717_v48 = vrot.slane %v716_v30, 4  ;;  %v750_v24 = vsel %vm2635_vm4, %v2028_v38, %v749_v39  ;;  %v2032_v61 = vrot.slane %v2024_v33, 9  ;;  %v765_v50 = vrot.slane %v2982_v57, 5 }
  0x61   : > { %v708_v52 = vsel %vm2641_vm5, %v703_v21, %v707_v15  ;;  %v523_v25 = vsel %vm2641_vm5, %v2863_v11, %v522_v44  ;;  %v537_v41 = vsel %vm2641_vm5, %v2906_v43, %v536_v63  ;;  %v754_v42 = vsel %vm2635_vm4, %v2029_v45, %v753_v40 }
  0x62   : > { %2353 = vmatpush3.bf16.msra.mxu0 %v3061_v54  ;;  %2377 = vmatpush3.bf16.msra.mxu1 %v3016_v47  ;;  %v722_v29 = vsel %vm2641_vm5, %v717_v48, %v721_v22  ;;  %v2055_v49 = vcombine.low %v523_v25, %v537_v41  ;;  %v2033_v3 = vrot.slane %v2025_v16, 9  ;;  %v2068_v58 = vcombine.low %v750_v24, %v754_v42 }
  0x63   : > { %2354 = vmatprep.subr.bf16.mxu0 %v2472_v32  ;;  %v2067_v11 = vcombine.low %v708_v52, %v722_v29  ;;  %2370 = vmatprep.subr.bf16.mxu1 %v3061_v54  ;;  %v766_v43 = vsel %vm2635_vm4, %v2032_v61, %v765_v50  ;;  %v769_v57 = vrot.slane %v2988_v59, 5  ;;  %v2030_v60 = vrot.slane %v2022_v46, 9 }
  0x64   : > { %1717 = vmatmul.mubr.bf16.gmra.mrb[28].mxu0 %v2055_v49  ;;  %v2031_v47 = vrot.slane %v2023_v51, 9  ;;  %v2034_v62 = vrot.slane %v2026_v14, 9  ;;  %v2035_v56 = vrot.slane %v2027_v37, 9 }
  0x65   : > { %1781 = vmatprep.mubr.bf16.mxu1 %v2067_v11  ;;  %v770_v0 = vsel %vm2635_vm4, %v2033_v3, %v769_v57  ;;  %2356 = vmatprep.mubr.bf16.mxu0 %v2068_v58  ;;  %v758_v2 = vsel %vm2635_vm4, %v2030_v60, %v757_v27 }
  0x66   : > { %2355 = vmatpush3.bf16.msra.mxu0 %v2472_v32  ;;  %2378 = vmatpush3.bf16.msra.mxu1 %v3061_v54  ;;  %v2070_v1 = vcombine.low %v766_v43, %v770_v0  ;;  %v762_v59 = vsel %vm2635_vm4, %v2031_v47, %v761_v28  ;;  %v774_v54 = vsel %vm2635_vm4, %v2034_v62, %v773_v36 }
  0x67   : > { %1782 = vmatmul.mubr.bf16.gmra.mrb[28].mxu1 %v2063_v35  ;;  %2371 = vmatprep.subr.bf16.mxu1 %v2472_v32  ;;  %v2069_v4 = vcombine.low %v758_v2, %v762_v59  ;;  %v778_v6 = vsel %vm2635_vm4, %v2035_v56, %v777_v10 }
  0x68   : > { %2360 = vmatprep.mubr.bf16.mxu1 %v2070_v1  ;;  %v2071_v27 = vcombine.low %v774_v54, %v778_v6 }
  0x6a   : > { %2379 = vmatpush3.bf16.msra.mxu1 %v2472_v32 }
  0x6c   : > { %2357 = vmatmul.mubr.bf16.vlgmr.msra.gmra.mrb[32].mxu0 %v2069_v4 }
  0x6f   : > { %2361 = vmatmul.mubr.bf16.vlgmr.msra.gmra.mrb[32].mxu1 %v2071_v27 }
  0xfa   : > { %v2184_v5 = vpop.f32.mrb[0].mxu0 }
  0xfb   : > { %v2224_v12 = vpop.f32.mrb[0].mxu1  ;;  %v2185_v9 = vpop.f32.mrb[1].mxu0 }
  0xfc   : > { %v2225_v28 = vpop.f32.mrb[1].mxu1  ;;  %v2186_v34 = vadd.f32 %v2185_v9, %v2184_v5  ;;  %v2187_v26 = vpop.f32.mrb[2].mxu0 }
  0xfd   : > { %v2226_v7 = vadd.f32 %v2225_v28, %v2224_v12  ;;  %v2227_v8 = vpop.f32.mrb[2].mxu1  ;;  %v2188_v55 = vpop.f32.mrb[3].mxu0 }
  0xfe   : > { %v2228_v36 = vpop.f32.mrb[3].mxu1  ;;  %v1565_v10 = vadd.f32 %v2186_v34, %v2072_v53  ;;  %v2189_v15 = vadd.f32 %v2188_v55, %v2187_v26 }
  0xff   : > { %v2229_v13 = vadd.f32 %v2228_v36, %v2227_v8 }
 0x100   : > { %v1630_v17 = vadd.f32 %v2226_v7, %v1565_v10  ;;  %v1568_v18 = vadd.f32 %v2189_v15, %v2072_v53 }
 0x102   : > { %v1633_v19 = vadd.f32 %v2229_v13, %v1568_v18  ;;  %v2190_v22 = vpop.f32.mrb[4].mxu0 }
 0x103   : > { %v2230_v20 = vpop.f32.mrb[4].mxu1  ;;  %v2191_v31 = vpop.f32.mrb[5].mxu0 }
 0x104   : > { %v2231_v23 = vpop.f32.mrb[5].mxu1  ;;  %v2192_v30 = vadd.f32 %v2191_v31, %v2190_v22  ;;  %v2193_v35 = vpop.f32.mrb[6].mxu0 }
 0x105   : > { %v2232_v32 = vadd.f32 %v2231_v23, %v2230_v20  ;;  %v2233_v33 = vpop.f32.mrb[6].mxu1  ;;  %v2194_v39 = vpop.f32.mrb[7].mxu0 }
 0x106   : > { %v2234_v38 = vpop.f32.mrb[7].mxu1  ;;  %v1573_v21 = vadd.f32 %v2192_v30, %v2072_v53  ;;  %v2195_v44 = vadd.f32 %v2194_v39, %v2193_v35 }
 0x107   : > { %v2235_v16 = vadd.f32 %v2234_v38, %v2233_v33 }
 0x108   : > { %v1638_v63 = vadd.f32 %v2232_v32, %v1573_v21  ;;  %v1576_v45 = vadd.f32 %v2195_v44, %v2072_v53 }
 0x10a   : > { %v1641_v46 = vadd.f32 %v2235_v16, %v1576_v45 }
 0x10c   : > { %v2196_v24 = vpop.f32.mrb[8].mxu0 }
 0x10d   : > { %v2236_v48 = vpop.f32.mrb[8].mxu1  ;;  %v2197_v61 = vpop.f32.mrb[9].mxu0 }
 0x10e   : > { %v2237_v40 = vpop.f32.mrb[9].mxu1  ;;  %v2198_v25 = vadd.f32 %v2197_v61, %v2196_v24  ;;  %v2199_v41 = vpop.f32.mrb[10].mxu0 }
 0x10f   : > { %v2238_v51 = vadd.f32 %v2237_v40, %v2236_v48  ;;  %v2239_v52 = vpop.f32.mrb[10].mxu1  ;;  %v2200_v14 = vpop.f32.mrb[11].mxu0 }
 0x110   : > { %v2240_v50 = vpop.f32.mrb[11].mxu1  ;;  %v1581_v29 = vadd.f32 %v2198_v25, %v2072_v53  ;;  %v2201_v49 = vadd.f32 %v2200_v14, %v2199_v41 }
 0x111   : > { %v2241_v37 = vadd.f32 %v2240_v50, %v2239_v52 }
 0x112   : > { %v1646_v42 = vadd.f32 %v2238_v51, %v1581_v29  ;;  %v1584_v3 = vadd.f32 %v2201_v49, %v2072_v53 }
 0x114   : > { %v1649_v11 = vadd.f32 %v2241_v37, %v1584_v3  ;;  %v2202_v43 = vpop.f32.mrb[12].mxu0 }
 0x115   : > { %v2242_v58 = vpop.f32.mrb[12].mxu1  ;;  %v2203_v60 = vpop.f32.mrb[13].mxu0 }
 0x116   : > { %v2243_v57 = vpop.f32.mrb[13].mxu1  ;;  %v2204_v56 = vadd.f32 %v2203_v60, %v2202_v43  ;;  %v2205_v0 = vpop.f32.mrb[14].mxu0 }
 0x117   : > { %v2244_v47 = vadd.f32 %v2243_v57, %v2242_v58  ;;  %v2245_v62 = vpop.f32.mrb[14].mxu1  ;;  %v2206_v2 = vpop.f32.mrb[15].mxu0 }
 0x118   : > { %v2246_v1 = vpop.f32.mrb[15].mxu1  ;;  %v1589_v4 = vadd.f32 %v2204_v56, %v2072_v53  ;;  %v2207_v54 = vadd.f32 %v2206_v2, %v2205_v0 }
 0x119   : > { %v2247_v59 = vadd.f32 %v2246_v1, %v2245_v62 }
 0x11a   : > { %v1654_v6 = vadd.f32 %v2244_v47, %v1589_v4  ;;  %v1592_v27 = vadd.f32 %v2207_v54, %v2072_v53  ;;  %v2150_v54 = vld [vmem:[%s212_s28] sm:$0xff]  }
 0x11c   : > { %v3148_v12 = vadd.f32 %v2247_v59, %v1592_v27  ;;  %v2264_v28 = vpop.f32.mrb[16].mxu0 }
 0x11d   : > { %v2265_v5 = vpop.f32.mrb[17].mxu0 }
 0x11e   : > { %v2266_v7 = vadd.f32 %v2265_v5, %v2264_v28  ;;  %v2267_v8 = vpop.f32.mrb[18].mxu0 }
 0x11f   : > { %v2268_v9 = vpop.f32.mrb[19].mxu0 }
 0x120   : > { %v1695_v36 = vadd.f32 %v2266_v7, %v1630_v17  ;;  %v2269_v34 = vadd.f32 %v2268_v9, %v2267_v8  ;;  %v2304_v13 = vpop.f32.mrb[16].mxu1  ;;  %v2167_v9 = vld [vmem:[%s212_s28 + $0x18] sm:$0xff]  }
 0x121   : > { %v2305_v55 = vpop.f32.mrb[17].mxu1 }
 0x122   : > { %v1698_v26 = vadd.f32 %v2269_v34, %v1633_v19  ;;  %v2306_v10 = vadd.f32 %v2305_v55, %v2304_v13  ;;  %v2307_v15 = vpop.f32.mrb[18].mxu1  ;;  %v2151_v34 = vunpack.c.l.bf16 %v2150_v54 }
 0x123   : > { %v2308_v18 = vpop.f32.mrb[19].mxu1 }
 0x124   : > { %v2309_v20 = vadd.f32 %v2308_v18, %v2307_v15  ;;  %v3150_v22 = vadd.f32 %v2306_v10, %v1695_v36 }
 0x126   : > { %v3152_v23 = vadd.f32 %v2309_v20, %v1698_v26  ;;  %v2166_v26 = vld [vmem:[%s212_s28 + $0x10] sm:$0xff]   ;;  %v2152_v20 = vunpack.c.h.bf16 %v2150_v54 }
 0x127   : > { %v2270_v53 = vpop.f32.mrb[20].mxu0 }
 0x128   : > { %v2271_v31 = vpop.f32.mrb[21].mxu0  ;;  %v2310_v32 = vpop.f32.mrb[20].mxu1 }
 0x129   : > { %v2272_v33 = vadd.f32 %v2271_v31, %v2270_v53  ;;  %v2273_v30 = vpop.f32.mrb[22].mxu0  ;;  %v2311_v35 = vpop.f32.mrb[21].mxu1 }
 0x12a   : > { %v2274_v38 = vpop.f32.mrb[23].mxu0  ;;  %v2312_v39 = vadd.f32 %v2311_v35, %v2310_v32  ;;  %v2313_v19 = vpop.f32.mrb[22].mxu1  ;;  %v2159_v32 = vunpack.c.l.bf16 %v2166_v26 }
 0x12b   : > { %v1703_v17 = vadd.f32 %v2272_v33, %v1638_v63  ;;  %v2275_v16 = vadd.f32 %v2274_v38, %v2273_v30  ;;  %v2314_v21 = vpop.f32.mrb[23].mxu1 }
 0x12c   : > { %v2315_v45 = vadd.f32 %v2314_v21, %v2313_v19 }
 0x12d   : > { %v1706_v44 = vadd.f32 %v2275_v16, %v1641_v46  ;;  %v1768_v48 = vadd.f32 %v2312_v39, %v1703_v17  ;;  %v2164_v39 = vunpack.c.h.bf16 %v2167_v9 }
 0x12f   : > { %v2276_v24 = vpop.f32.mrb[24].mxu0  ;;  %v1771_v40 = vadd.f32 %v2315_v45, %v1706_v44  ;;  %v2160_v44 = vunpack.c.h.bf16 %v2166_v26 }
 0x130   : > { %v2277_v61 = vpop.f32.mrb[25].mxu0 }
 0x131   : > { %v2278_v51 = vadd.f32 %v2277_v61, %v2276_v24  ;;  %v2279_v52 = vpop.f32.mrb[26].mxu0 }
 0x132   : > { %v2280_v25 = vpop.f32.mrb[27].mxu0  ;;  %v2316_v41 = vpop.f32.mrb[24].mxu1 }
 0x133   : > { %v1711_v50 = vadd.f32 %v2278_v51, %v1646_v42  ;;  %v2281_v14 = vadd.f32 %v2280_v25, %v2279_v52  ;;  %v2317_v37 = vpop.f32.mrb[25].mxu1 }
 0x134   : > { %v2318_v29 = vadd.f32 %v2317_v37, %v2316_v41  ;;  %v2319_v63 = vpop.f32.mrb[26].mxu1 }
 0x135   : > { %v1714_v49 = vadd.f32 %v2281_v14, %v1649_v11  ;;  %v2320_v3 = vpop.f32.mrb[27].mxu1  ;;  %v2165_v11 = vld [vmem:[%s212_s28 + $0x8] sm:$0xff]  }
 0x136   : > { %v2321_v58 = vadd.f32 %v2320_v3, %v2319_v63  ;;  %v1776_v46 = vadd.f32 %v2318_v29, %v1711_v50  ;;  %v2155_v7 = vunpack.c.l.bf16 %v2165_v11 }
 0x137   : > { %v2282_v43 = vpop.f32.mrb[28].mxu0 }
 0x138   : > { %v2283_v57 = vpop.f32.mrb[29].mxu0  ;;  %v1779_v60 = vadd.f32 %v2321_v58, %v1714_v49 }
 0x139   : > { %v2284_v47 = vadd.f32 %v2283_v57, %v2282_v43  ;;  %v2285_v62 = vpop.f32.mrb[30].mxu0 }
 0x13a   : > { %v2322_v42 = vpop.f32.mrb[28].mxu1  ;;  %v2286_v56 = vpop.f32.mrb[31].mxu0 }
 0x13b   : > { %v1719_v0 = vadd.f32 %v2284_v47, %v1654_v6  ;;  %v2323_v1 = vpop.f32.mrb[29].mxu1  ;;  %v2287_v2 = vadd.f32 %v2286_v56, %v2285_v62  ;;  %v2156_v6 = vunpack.c.h.bf16 %v2165_v11 }
 0x13c   : > { %v2324_v59 = vadd.f32 %v2323_v1, %v2322_v42  ;;  %v2325_v4 = vpop.f32.mrb[30].mxu1 }
 0x13d   : > { %v1722_v27 = vadd.f32 %v2287_v2, %v3148_v12  ;;  %v2326_v28 = vpop.f32.mrb[31].mxu1  ;;  %v2163_v12 = vunpack.c.l.bf16 %v2167_v9 }
 0x13e   : > { %v2327_v5 = vadd.f32 %v2326_v28, %v2325_v4  ;;  %v1784_v8 = vadd.f32 %v2324_v59, %v1719_v0 }
 0x13f   : > { %v2358_v36 = vpop.f32.mrb[32].mxu0 }
 0x140   : > { %v1833_v13 = vadd.f32 %v2358_v36, %v1768_v48  ;;  %v1824_v55 = vpop.f32.mrb[33].mxu0  ;;  %v1787_v10 = vadd.f32 %v2327_v5, %v1722_v27 }
 0x141   : > { %v1825_v15 = vadd.f32 %v1824_v55, %v3150_v22  ;;  %v2359_v18 = vpop.f32.mrb[34].mxu0 }
 0x142   : > { %v1873_v53 = vadd.f32 %v2155_v7, %v1833_v13  ;;  %v2362_v31 = vpop.f32.mrb[32].mxu1  ;;  %v1836_v33 = vadd.f32 %v2359_v18, %v1771_v40  ;;  %v1827_v30 = vpop.f32.mrb[35].mxu0 }
 0x143   : > { %v1849_v35 = vadd.f32 %v2362_v31, %v1784_v8  ;;  %v1871_v38 = vadd.f32 %v2151_v34, %v1825_v15  ;;  %v1840_v17 = vpop.f32.mrb[33].mxu1  ;;  %v1828_v19 = vadd.f32 %v1827_v30, %v3152_v23 }
 0x144   : > { %1881 = vst [vmem:[%s3163_s7 + $0x10] sm:$0xff] %v1873_v53  ;;  %v1841_v22 = vadd.f32 %v1840_v17, %v1776_v46  ;;  %v1874_v16 = vadd.f32 %v2156_v6, %v1836_v33  ;;  %v2363_v21 = vpop.f32.mrb[34].mxu1 }
 0x145   : > { %v1877_v45 = vadd.f32 %v2163_v12, %v1849_v35  ;;  %1879 = vst [vmem:[%s3163_s7] sm:$0xff] %v1871_v38  ;;  %v1852_v48 = vadd.f32 %v2363_v21, %v1787_v10  ;;  %v1872_v24 = vadd.f32 %v2152_v20, %v1828_v19  ;;  %v1843_v40 = vpop.f32.mrb[35].mxu1 }
 0x146   : > { %v1875_v61 = vadd.f32 %v2159_v32, %v1841_v22  ;;  %1882 = vst [vmem:[%s3163_s7 + $0x18] sm:$0xff] %v1874_v16  ;;  %v1844_v51 = vadd.f32 %v1843_v40, %v1779_v60 }
 0x147   : > { %1885 = vst [vmem:[%s3163_s7 + $0x30] sm:$0xff] %v1877_v45  ;;  %v1878_v52 = vadd.f32 %v2164_v39, %v1852_v48  ;;  %1880 = vst [vmem:[%s3163_s7 + $0x8] sm:$0xff] %v1872_v24 }
 0x148   : > { %1883 = vst [vmem:[%s3163_s7 + $0x20] sm:$0xff] %v1875_v61  ;;  %v1876_v23 = vadd.f32 %v2160_v44, %v1844_v51 }
 0x149   : > { %1886 = vst [vmem:[%s3163_s7 + $0x38] sm:$0xff] %v1878_v52 }
 0x14a   : > { %1884 = vst [vmem:[%s3163_s7 + $0x28] sm:$0xff] %v1876_v23 }
 0x14b PF: > { %s14_s15 = sadd.s32 1, %s2479_s15  }
 0x14c   : > { %p11_p4 = scmp.ge.s32.totalorder %s14_s15, 4  }
 0x14e   :  { %13 = sbr.rel (!%p11_p4) target bundleno = 1 (0x1), region = 71 }

</bundles_post_ra>
